<compile_context>
chip_gen: v6e
topology: v6e:2x2x1
jax: 0.10.0
libtpu: 0.0.40
codegen_flags: <defaults>
</compile_context>

<pallas_src>
import functools

import jax
import jax.numpy as jnp
from jax.experimental import pallas as pl
from jax.experimental.pallas import tpu as pltpu


# ---------------------------------------------------------------------------
# Fused kernel: first Linear+ReLU -> wavefront L-layer LSTM -> ReLU -> Linear.
# PyTorch LSTM gate order: i, f, g, o.  Zero initial (h, c) as in nn.LSTM.
# ---------------------------------------------------------------------------
def _fused_kernel(*refs, B, T, I, H, O, L):
    # refs: x(T,B,I), w1(I,I), b1(1,I), wih0(I,4H), b0(1,4H), R(L*H, L*4H),
    #       [b_m (1,4H) for m=1..L-1], wl(H,O), bl(1,O),
    #       out(T*B,O), st(2*L*B,H), ys_scratch(T*B,H)
    idx = 0
    x_ref = refs[idx]; idx += 1
    w1_ref = refs[idx]; idx += 1
    b1_ref = refs[idx]; idx += 1
    wih0_ref = refs[idx]; idx += 1
    b0_ref = refs[idx]; idx += 1
    r_ref = refs[idx]; idx += 1
    brest_refs = []
    for _ in range(L - 1):
        brest_refs.append(refs[idx]); idx += 1
    wl_ref = refs[idx]; idx += 1
    bl_ref = refs[idx]; idx += 1
    out_ref = refs[idx]; idx += 1
    st_ref = refs[idx]; idx += 1
    ys_ref = refs[idx]; idx += 1

    G = 4 * H

    # ---- first Linear + ReLU, all timesteps at once (time-major rows) -----
    x2d = x_ref[...].reshape(T * B, I)                                # (T*B, I)
    cur = jnp.maximum(
        jnp.dot(x2d, w1_ref[...], preferred_element_type=jnp.float32)
        + b1_ref[...], 0.0)                                           # (T*B, I)

    # ---- hoisted layer-0 input projection (+ combined bias) ---------------
    gx0 = (jnp.dot(cur, wih0_ref[...], preferred_element_type=jnp.float32)
           + b0_ref[...]).reshape(T, B, G)                            # (T, B, 4H)

    # Hoisted per-wave additive slab: lanes [0:G) = gx0[t];
    # lanes [m*G:(m+1)*G) = bias of layer m (time-independent), m >= 1.
    if L > 1:
        slab = jnp.concatenate(
            [gx0] + [jnp.broadcast_to(b[...], (T, B, G)) for b in brest_refs],
            axis=-1)                                                  # (T, B, L*G)
    else:
        slab = gx0

    R = r_ref[...]                                                    # (L*H, L*G)

    h = [jnp.zeros((B, H), jnp.float32) for _ in range(L)]
    c = [jnp.zeros((B, H), jnp.float32) for _ in range(L)]

    # ---- wavefront recurrence: wave w runs layer l at time t = w - l -------
    # One MXU op per wave:  [h_0 | ... | h_{L-1}] @ R  produces, per layer m,
    # lanes [m*G:(m+1)*G) = h_{m-1} @ wih_m + h_m @ whh_m  (input proj for
    # m==0 comes from the hoisted gx0 slab instead).
    for w in range(T + L - 1):
        lhs = h[0] if L == 1 else jnp.concatenate(h, axis=1)          # (B, L*H)
        mm = jnp.dot(lhs, R, preferred_element_type=jnp.float32)      # (B, L*G)
        g = mm + slab[min(w, T - 1)]                                  # (B, L*G)
        sg = jax.nn.sigmoid(g)      # full-width: one EUP pass covers all layers
        tg = jnp.tanh(g)            # full-width: rides the free EUP slot
        for l in range(L):
            t = w - l
            if 0 <= t < T:          # static (unrolled) guard
                o0 = l * G
                i_g = sg[:, o0 + 0 * H:o0 + 1 * H]
                f_g = sg[:, o0 + 1 * H:o0 + 2 * H]
                g_g = tg[:, o0 + 2 * H:o0 + 3 * H]
                o_g = sg[:, o0 + 3 * H:o0 + 4 * H]
                c[l] = f_g * c[l] + i_g * g_g
                h[l] = o_g * jnp.tanh(c[l])
                if l == L - 1:
                    # direct contiguous row store (time-major), ReLU fused in
                    ys_ref[t * B:(t + 1) * B, :] = jnp.maximum(h[l], 0.0)

    # ---- final Linear over all timesteps -----------------------------------
    y = ys_ref[...]                                                   # (T*B, H)
    out = (jnp.dot(y, wl_ref[...], preferred_element_type=jnp.float32)
           + bl_ref[...])                                             # (T*B, O)
    out_ref[...] = out.astype(out_ref.dtype)

    # ---- final states, packed: rows [l*B:(l+1)*B)=h_l, [(L+l)*B:...)=c_l ---
    for l in range(L):
        st_ref[l * B:(l + 1) * B, :] = h[l].astype(st_ref.dtype)
        st_ref[(L + l) * B:(L + l + 1) * B, :] = c[l].astype(st_ref.dtype)

    # TODO(synk): whh could be kept staged in the MXU across waves via
    # pltpu.matmul_push_rhs/acc_lhs/pop; left to Mosaic's scheduler here.


# ---------------------------------------------------------------------------
# Wrapper: one fused pallas_call for the whole model forward.
# ---------------------------------------------------------------------------
@jax.jit
def model_forward(data, params):
    B, T, I = data.shape
    L = len(params["lstm"])
    H = params["lstm"][0]["whh_t"].shape[0]
    O = params["wl_t"].shape[1]
    G = 4 * H

    # time-major input (tiny transpose, done by XLA outside the kernel)
    x_tm = jnp.transpose(data, (1, 0, 2))                              # (T, B, I)

    # Banded block recurrent-weight matrix for the wavefront matmul.
    R = jnp.zeros((L * H, L * G), jnp.float32)
    for l, lp in enumerate(params["lstm"]):
        R = R.at[l * H:(l + 1) * H, l * G:(l + 1) * G].set(lp["whh_t"])
        if l >= 1:
            R = R.at[(l - 1) * H:l * H, l * G:(l + 1) * G].set(lp["wih_t"])

    args = [x_tm,
            params["w1_t"], params["b1"].reshape(1, I),
            params["lstm"][0]["wih_t"], params["lstm"][0]["b"].reshape(1, G),
            R]
    for lp in params["lstm"][1:]:
        args.append(lp["b"].reshape(1, G))
    args += [params["wl_t"], params["bl"].reshape(1, O)]

    vmem = pl.BlockSpec(memory_space=pltpu.MemorySpace.VMEM)
    out2d, state = pl.pallas_call(
        functools.partial(_fused_kernel, B=B, T=T, I=I, H=H, O=O, L=L),
        in_specs=[vmem] * len(args),
        out_specs=(vmem, vmem),
        out_shape=(jax.ShapeDtypeStruct((T * B, O), data.dtype),
                   jax.ShapeDtypeStruct((2 * L * B, H), data.dtype)),
        scratch_shapes=[pltpu.VMEM((T * B, H), jnp.float32)],
    )(*args)

    out = out2d.reshape(T, B, O).transpose(1, 0, 2)                    # (B, T, O)
    st = state.reshape(2, L, B, H)
    return out, (st[0], st[1])


# ---------------------------------------------------------------------------
# Pure-JAX reference (for correctness check).
# ---------------------------------------------------------------------------
def reference_forward(data, params):
    x = jnp.maximum(data @ params["w1_t"] + params["b1"], 0.0)
    hns, cns = [], []
    for lp in params["lstm"]:
        B, T, _ = x.shape
        H = lp["whh_t"].shape[0]
        h = jnp.zeros((B, H), jnp.float32)
        c = jnp.zeros((B, H), jnp.float32)

        def step(carry, x_t):
            h, c = carry
            g = x_t @ lp["wih_t"] + h @ lp["whh_t"] + lp["b"]
            i = jax.nn.sigmoid(g[:, 0 * H:1 * H])
            f = jax.nn.sigmoid(g[:, 1 * H:2 * H])
            gg = jnp.tanh(g[:, 2 * H:3 * H])
            o = jax.nn.sigmoid(g[:, 3 * H:4 * H])
            c = f * c + i * gg
            h = o * jnp.tanh(c)
            return (h, c), h

        (h, c), ys = jax.lax.scan(step, (h, c), x.transpose(1, 0, 2))
        hns.append(h)
        cns.append(c)
        x = ys.transpose(1, 0, 2)
    x = jnp.maximum(x, 0.0)
    out = x @ params["wl_t"] + params["bl"]
    return out, jnp.stack(hns), jnp.stack(cns)


# ---------------------------------------------------------------------------
def make_params(key, n_input, n_hidden, n_layers, n_output):
    ks = iter(jax.random.split(key, 4 + 4 * n_layers))

    def u(k, shape, fan):
        bound = 1.0 / jnp.sqrt(float(fan))
        return jax.random.uniform(k, shape, jnp.float32, -bound, bound)

    params = {
        "w1_t": u(next(ks), (n_input, n_input), n_input),
        "b1": u(next(ks), (n_input,), n_input),
        "wl_t": u(next(ks), (n_hidden, n_output), n_hidden),
        "bl": u(next(ks), (n_output,), n_hidden),
        "lstm": [],
    }
    for layer in range(n_layers):
        in_dim = n_input if layer == 0 else n_hidden
        params["lstm"].append({
            "wih_t": u(next(ks), (in_dim, 4 * n_hidden), n_hidden),
            "whh_t": u(next(ks), (n_hidden, 4 * n_hidden), n_hidden),
            # combined b_ih + b_hh
            "b": u(next(ks), (4 * n_hidden,), n_hidden)
                 + u(next(ks), (4 * n_hidden,), n_hidden),
        })
    return params


if __name__ == "__main__":
    # config: input=32, hidden_size=32, layers=2, output=8
    B, T = 2, 8
    N_INPUT, N_HIDDEN, N_LAYERS, N_OUTPUT = 32, 32, 2, 8

    key = jax.random.PRNGKey(0)
    k_data, k_params = jax.random.split(key)
    data = jax.random.normal(k_data, (B, T, N_INPUT), jnp.float32)
    params = make_params(k_params, N_INPUT, N_HIDDEN, N_LAYERS, N_OUTPUT)

    out, (hn, cn) = model_forward(data, params)
    out = jax.block_until_ready(out)
    hn = jax.block_until_ready(hn)
    cn = jax.block_until_ready(cn)

    ref_out, ref_hn, ref_cn = reference_forward(data, params)
    assert out.shape == (B, T, N_OUTPUT)
    assert hn.shape == (N_LAYERS, B, N_HIDDEN)
    assert cn.shape == (N_LAYERS, B, N_HIDDEN)
    assert jnp.allclose(out, ref_out, atol=1e-4, rtol=1e-4)
    assert jnp.allclose(hn, ref_hn, atol=1e-4, rtol=1e-4)
    assert jnp.allclose(cn, ref_cn, atol=1e-4, rtol=1e-4)

    print("KERNEL_OK")
</pallas_src>

<mosaic_0001>
module attributes {stable_mosaic.version = 11 : i64} {
  func.func @_fused_kernel(%arg0: memref<8x2x32xf32, #tpu.memory_space<vmem>>, %arg1: memref<32x32xf32, #tpu.memory_space<vmem>>, %arg2: memref<1x32xf32, #tpu.memory_space<vmem>>, %arg3: memref<32x128xf32, #tpu.memory_space<vmem>>, %arg4: memref<1x128xf32, #tpu.memory_space<vmem>>, %arg5: memref<64x256xf32, #tpu.memory_space<vmem>>, %arg6: memref<1x128xf32, #tpu.memory_space<vmem>>, %arg7: memref<32x8xf32, #tpu.memory_space<vmem>>, %arg8: memref<1x8xf32, #tpu.memory_space<vmem>>, %arg9: memref<16x8xf32, #tpu.memory_space<vmem>>, %arg10: memref<8x32xf32, #tpu.memory_space<vmem>>, %arg11: memref<16x32xf32, #tpu.memory_space<vmem>>) attributes {dimension_semantics = [], scalar_prefetch = 0 : i64, scratch_operands = 1 : i64, tpu.core_type = #tpu.core_type<tc>} {
    %c0 = arith.constant 0 : index
    %c0_0 = arith.constant 0 : index
    %c0_1 = arith.constant 0 : index
    %0 = vector.load %arg0[%c0, %c0_0, %c0_1] : memref<8x2x32xf32, #tpu.memory_space<vmem>>, vector<8x2x32xf32>
    %1 = vector.shape_cast %0 : vector<8x2x32xf32> to vector<16x32xf32>
    %c0_2 = arith.constant 0 : index
    %c0_3 = arith.constant 0 : index
    %2 = vector.load %arg1[%c0_2, %c0_3] : memref<32x32xf32, #tpu.memory_space<vmem>>, vector<32x32xf32>
    %cst = arith.constant dense<0.000000e+00> : vector<16x32xf32>
    %3 = tpu.matmul %1, %2, %cst {dimension_numbers = #tpu.dot_dimension_numbers<[1], [0], [0], [1], [0, 0, 1, 1], [], []>} : vector<16x32xf32>, vector<32x32xf32>, vector<16x32xf32> -> vector<16x32xf32>
    %c0_4 = arith.constant 0 : index
    %c0_5 = arith.constant 0 : index
    %4 = vector.load %arg2[%c0_4, %c0_5] : memref<1x32xf32, #tpu.memory_space<vmem>>, vector<1x32xf32>
    %5 = vector.broadcast %4 : vector<1x32xf32> to vector<16x32xf32>
    %6 = arith.addf %3, %5 : vector<16x32xf32>
    %cst_6 = arith.constant 0.000000e+00 : f32
    %7 = vector.broadcast %cst_6 : f32 to vector<16x32xf32>
    %8 = arith.maximumf %6, %7 : vector<16x32xf32>
    %c0_7 = arith.constant 0 : index
    %c0_8 = arith.constant 0 : index
    %9 = vector.load %arg3[%c0_7, %c0_8] : memref<32x128xf32, #tpu.memory_space<vmem>>, vector<32x128xf32>
    %cst_9 = arith.constant dense<0.000000e+00> : vector<16x128xf32>
    %10 = tpu.matmul %8, %9, %cst_9 {dimension_numbers = #tpu.dot_dimension_numbers<[1], [0], [0], [1], [0, 0, 1, 1], [], []>} : vector<16x32xf32>, vector<32x128xf32>, vector<16x128xf32> -> vector<16x128xf32>
    %c0_10 = arith.constant 0 : index
    %c0_11 = arith.constant 0 : index
    %11 = vector.load %arg4[%c0_10, %c0_11] : memref<1x128xf32, #tpu.memory_space<vmem>>, vector<1x128xf32>
    %12 = vector.broadcast %11 : vector<1x128xf32> to vector<16x128xf32>
    %13 = arith.addf %10, %12 : vector<16x128xf32>
    %14 = vector.shape_cast %13 : vector<16x128xf32> to vector<8x2x128xf32>
    %c0_12 = arith.constant 0 : index
    %c0_13 = arith.constant 0 : index
    %15 = vector.load %arg6[%c0_12, %c0_13] : memref<1x128xf32, #tpu.memory_space<vmem>>, vector<1x128xf32>
    %16 = vector.shape_cast %15 : vector<1x128xf32> to vector<1x1x128xf32>
    %17 = vector.broadcast %16 : vector<1x1x128xf32> to vector<8x2x128xf32>
    %18 = tpu.concatenate %14, %17 in 2 : vector<8x2x128xf32>, vector<8x2x128xf32> -> vector<8x2x256xf32>
    %c0_14 = arith.constant 0 : index
    %c0_15 = arith.constant 0 : index
    %19 = vector.load %arg5[%c0_14, %c0_15] : memref<64x256xf32, #tpu.memory_space<vmem>>, vector<64x256xf32>
    %cst_16 = arith.constant 0.000000e+00 : f32
    %20 = vector.broadcast %cst_16 : f32 to vector<2x32xf32>
    %cst_17 = arith.constant 0.000000e+00 : f32
    %21 = vector.broadcast %cst_17 : f32 to vector<2x32xf32>
    %cst_18 = arith.constant 0.000000e+00 : f32
    %22 = vector.broadcast %cst_18 : f32 to vector<2x32xf32>
    %cst_19 = arith.constant 0.000000e+00 : f32
    %23 = vector.broadcast %cst_19 : f32 to vector<2x32xf32>
    %24 = tpu.concatenate %20, %21 in 1 : vector<2x32xf32>, vector<2x32xf32> -> vector<2x64xf32>
    %cst_20 = arith.constant dense<0.000000e+00> : vector<2x256xf32>
    %25 = tpu.matmul %24, %19, %cst_20 {dimension_numbers = #tpu.dot_dimension_numbers<[1], [0], [0], [1], [0, 0, 1, 1], [], []>} : vector<2x64xf32>, vector<64x256xf32>, vector<2x256xf32> -> vector<2x256xf32>
    %26 = vector.extract_strided_slice %18 {offsets = [0, 0, 0], sizes = [1, 2, 256], strides = [1, 1, 1]} : vector<8x2x256xf32> to vector<1x2x256xf32>
    %27 = vector.shape_cast %26 : vector<1x2x256xf32> to vector<2x256xf32>
    %28 = arith.addf %25, %27 : vector<2x256xf32>
    %29 = arith.negf %28 : vector<2x256xf32>
    %30 = math.exp %29 : vector<2x256xf32>
    %cst_21 = arith.constant 1.000000e+00 : f32
    %31 = vector.broadcast %cst_21 : f32 to vector<2x256xf32>
    %32 = arith.addf %31, %30 : vector<2x256xf32>
    %33 = arith.divf %31, %32 : vector<2x256xf32>
    %34 = math.tanh %28 : vector<2x256xf32>
    %35 = vector.extract_strided_slice %33 {offsets = [0, 0], sizes = [2, 32], strides = [1, 1]} : vector<2x256xf32> to vector<2x32xf32>
    %36 = vector.extract_strided_slice %33 {offsets = [0, 32], sizes = [2, 32], strides = [1, 1]} : vector<2x256xf32> to vector<2x32xf32>
    %37 = vector.extract_strided_slice %34 {offsets = [0, 64], sizes = [2, 32], strides = [1, 1]} : vector<2x256xf32> to vector<2x32xf32>
    %38 = vector.extract_strided_slice %33 {offsets = [0, 96], sizes = [2, 32], strides = [1, 1]} : vector<2x256xf32> to vector<2x32xf32>
    %39 = arith.mulf %36, %22 : vector<2x32xf32>
    %40 = arith.mulf %35, %37 : vector<2x32xf32>
    %41 = arith.addf %39, %40 : vector<2x32xf32>
    %42 = math.tanh %41 : vector<2x32xf32>
    %43 = arith.mulf %38, %42 : vector<2x32xf32>
    %44 = tpu.concatenate %43, %21 in 1 : vector<2x32xf32>, vector<2x32xf32> -> vector<2x64xf32>
    %cst_22 = arith.constant dense<0.000000e+00> : vector<2x256xf32>
    %45 = tpu.matmul %44, %19, %cst_22 {dimension_numbers = #tpu.dot_dimension_numbers<[1], [0], [0], [1], [0, 0, 1, 1], [], []>} : vector<2x64xf32>, vector<64x256xf32>, vector<2x256xf32> -> vector<2x256xf32>
    %46 = vector.extract_strided_slice %18 {offsets = [1, 0, 0], sizes = [1, 2, 256], strides = [1, 1, 1]} : vector<8x2x256xf32> to vector<1x2x256xf32>
    %47 = vector.shape_cast %46 : vector<1x2x256xf32> to vector<2x256xf32>
    %48 = arith.addf %45, %47 : vector<2x256xf32>
    %49 = arith.negf %48 : vector<2x256xf32>
    %50 = math.exp %49 : vector<2x256xf32>
    %cst_23 = arith.constant 1.000000e+00 : f32
    %51 = vector.broadcast %cst_23 : f32 to vector<2x256xf32>
    %52 = arith.addf %51, %50 : vector<2x256xf32>
    %53 = arith.divf %51, %52 : vector<2x256xf32>
    %54 = math.tanh %48 : vector<2x256xf32>
    %55 = vector.extract_strided_slice %53 {offsets = [0, 0], sizes = [2, 32], strides = [1, 1]} : vector<2x256xf32> to vector<2x32xf32>
    %56 = vector.extract_strided_slice %53 {offsets = [0, 32], sizes = [2, 32], strides = [1, 1]} : vector<2x256xf32> to vector<2x32xf32>
    %57 = vector.extract_strided_slice %54 {offsets = [0, 64], sizes = [2, 32], strides = [1, 1]} : vector<2x256xf32> to vector<2x32xf32>
    %58 = vector.extract_strided_slice %53 {offsets = [0, 96], sizes = [2, 32], strides = [1, 1]} : vector<2x256xf32> to vector<2x32xf32>
    %59 = arith.mulf %56, %41 : vector<2x32xf32>
    %60 = arith.mulf %55, %57 : vector<2x32xf32>
    %61 = arith.addf %59, %60 : vector<2x32xf32>
    %62 = math.tanh %61 : vector<2x32xf32>
    %63 = arith.mulf %58, %62 : vector<2x32xf32>
    %64 = vector.extract_strided_slice %53 {offsets = [0, 128], sizes = [2, 32], strides = [1, 1]} : vector<2x256xf32> to vector<2x32xf32>
    %65 = vector.extract_strided_slice %53 {offsets = [0, 160], sizes = [2, 32], strides = [1, 1]} : vector<2x256xf32> to vector<2x32xf32>
    %66 = vector.extract_strided_slice %54 {offsets = [0, 192], sizes = [2, 32], strides = [1, 1]} : vector<2x256xf32> to vector<2x32xf32>
    %67 = vector.extract_strided_slice %53 {offsets = [0, 224], sizes = [2, 32], strides = [1, 1]} : vector<2x256xf32> to vector<2x32xf32>
    %68 = arith.mulf %65, %23 : vector<2x32xf32>
    %69 = arith.mulf %64, %66 : vector<2x32xf32>
    %70 = arith.addf %68, %69 : vector<2x32xf32>
    %71 = math.tanh %70 : vector<2x32xf32>
    %72 = arith.mulf %67, %71 : vector<2x32xf32>
    %cst_24 = arith.constant 0.000000e+00 : f32
    %73 = vector.broadcast %cst_24 : f32 to vector<2x32xf32>
    %74 = arith.maximumf %72, %73 : vector<2x32xf32>
    %c0_25 = arith.constant 0 : index
    %c0_26 = arith.constant 0 : index
    %75 = vector.load %arg11[%c0_25, %c0_26] : memref<16x32xf32, #tpu.memory_space<vmem>>, vector<2x32xf32>
    tpu.vector_store %arg11[%c0_25, %c0_26], %74 {strides = array<i32>} : memref<16x32xf32, #tpu.memory_space<vmem>>, vector<2x32xf32>,
    %76 = tpu.concatenate %63, %72 in 1 : vector<2x32xf32>, vector<2x32xf32> -> vector<2x64xf32>
    %cst_27 = arith.constant dense<0.000000e+00> : vector<2x256xf32>
    %77 = tpu.matmul %76, %19, %cst_27 {dimension_numbers = #tpu.dot_dimension_numbers<[1], [0], [0], [1], [0, 0, 1, 1], [], []>} : vector<2x64xf32>, vector<64x256xf32>, vector<2x256xf32> -> vector<2x256xf32>
    %78 = vector.extract_strided_slice %18 {offsets = [2, 0, 0], sizes = [1, 2, 256], strides = [1, 1, 1]} : vector<8x2x256xf32> to vector<1x2x256xf32>
    %79 = vector.shape_cast %78 : vector<1x2x256xf32> to vector<2x256xf32>
    %80 = arith.addf %77, %79 : vector<2x256xf32>
    %81 = arith.negf %80 : vector<2x256xf32>
    %82 = math.exp %81 : vector<2x256xf32>
    %cst_28 = arith.constant 1.000000e+00 : f32
    %83 = vector.broadcast %cst_28 : f32 to vector<2x256xf32>
    %84 = arith.addf %83, %82 : vector<2x256xf32>
    %85 = arith.divf %83, %84 : vector<2x256xf32>
    %86 = math.tanh %80 : vector<2x256xf32>
    %87 = vector.extract_strided_slice %85 {offsets = [0, 0], sizes = [2, 32], strides = [1, 1]} : vector<2x256xf32> to vector<2x32xf32>
    %88 = vector.extract_strided_slice %85 {offsets = [0, 32], sizes = [2, 32], strides = [1, 1]} : vector<2x256xf32> to vector<2x32xf32>
    %89 = vector.extract_strided_slice %86 {offsets = [0, 64], sizes = [2, 32], strides = [1, 1]} : vector<2x256xf32> to vector<2x32xf32>
    %90 = vector.extract_strided_slice %85 {offsets = [0, 96], sizes = [2, 32], strides = [1, 1]} : vector<2x256xf32> to vector<2x32xf32>
    %91 = arith.mulf %88, %61 : vector<2x32xf32>
    %92 = arith.mulf %87, %89 : vector<2x32xf32>
    %93 = arith.addf %91, %92 : vector<2x32xf32>
    %94 = math.tanh %93 : vector<2x32xf32>
    %95 = arith.mulf %90, %94 : vector<2x32xf32>
    %96 = vector.extract_strided_slice %85 {offsets = [0, 128], sizes = [2, 32], strides = [1, 1]} : vector<2x256xf32> to vector<2x32xf32>
    %97 = vector.extract_strided_slice %85 {offsets = [0, 160], sizes = [2, 32], strides = [1, 1]} : vector<2x256xf32> to vector<2x32xf32>
    %98 = vector.extract_strided_slice %86 {offsets = [0, 192], sizes = [2, 32], strides = [1, 1]} : vector<2x256xf32> to vector<2x32xf32>
    %99 = vector.extract_strided_slice %85 {offsets = [0, 224], sizes = [2, 32], strides = [1, 1]} : vector<2x256xf32> to vector<2x32xf32>
    %100 = arith.mulf %97, %70 : vector<2x32xf32>
    %101 = arith.mulf %96, %98 : vector<2x32xf32>
    %102 = arith.addf %100, %101 : vector<2x32xf32>
    %103 = math.tanh %102 : vector<2x32xf32>
    %104 = arith.mulf %99, %103 : vector<2x32xf32>
    %cst_29 = arith.constant 0.000000e+00 : f32
    %105 = vector.broadcast %cst_29 : f32 to vector<2x32xf32>
    %106 = arith.maximumf %104, %105 : vector<2x32xf32>
    %c2 = arith.constant 2 : index
    %c0_30 = arith.constant 0 : index
    %107 = vector.load %arg11[%c2, %c0_30] : memref<16x32xf32, #tpu.memory_space<vmem>>, vector<2x32xf32>
    tpu.vector_store %arg11[%c2, %c0_30], %106 {strides = array<i32>} : memref<16x32xf32, #tpu.memory_space<vmem>>, vector<2x32xf32>,
    %108 = tpu.concatenate %95, %104 in 1 : vector<2x32xf32>, vector<2x32xf32> -> vector<2x64xf32>
    %cst_31 = arith.constant dense<0.000000e+00> : vector<2x256xf32>
    %109 = tpu.matmul %108, %19, %cst_31 {dimension_numbers = #tpu.dot_dimension_numbers<[1], [0], [0], [1], [0, 0, 1, 1], [], []>} : vector<2x64xf32>, vector<64x256xf32>, vector<2x256xf32> -> vector<2x256xf32>
    %110 = vector.extract_strided_slice %18 {offsets = [3, 0, 0], sizes = [1, 2, 256], strides = [1, 1, 1]} : vector<8x2x256xf32> to vector<1x2x256xf32>
    %111 = vector.shape_cast %110 : vector<1x2x256xf32> to vector<2x256xf32>
    %112 = arith.addf %109, %111 : vector<2x256xf32>
    %113 = arith.negf %112 : vector<2x256xf32>
    %114 = math.exp %113 : vector<2x256xf32>
    %cst_32 = arith.constant 1.000000e+00 : f32
    %115 = vector.broadcast %cst_32 : f32 to vector<2x256xf32>
    %116 = arith.addf %115, %114 : vector<2x256xf32>
    %117 = arith.divf %115, %116 : vector<2x256xf32>
    %118 = math.tanh %112 : vector<2x256xf32>
    %119 = vector.extract_strided_slice %117 {offsets = [0, 0], sizes = [2, 32], strides = [1, 1]} : vector<2x256xf32> to vector<2x32xf32>
    %120 = vector.extract_strided_slice %117 {offsets = [0, 32], sizes = [2, 32], strides = [1, 1]} : vector<2x256xf32> to vector<2x32xf32>
    %121 = vector.extract_strided_slice %118 {offsets = [0, 64], sizes = [2, 32], strides = [1, 1]} : vector<2x256xf32> to vector<2x32xf32>
    %122 = vector.extract_strided_slice %117 {offsets = [0, 96], sizes = [2, 32], strides = [1, 1]} : vector<2x256xf32> to vector<2x32xf32>
    %123 = arith.mulf %120, %93 : vector<2x32xf32>
    %124 = arith.mulf %119, %121 : vector<2x32xf32>
    %125 = arith.addf %123, %124 : vector<2x32xf32>
    %126 = math.tanh %125 : vector<2x32xf32>
    %127 = arith.mulf %122, %126 : vector<2x32xf32>
    %128 = vector.extract_strided_slice %117 {offsets = [0, 128], sizes = [2, 32], strides = [1, 1]} : vector<2x256xf32> to vector<2x32xf32>
    %129 = vector.extract_strided_slice %117 {offsets = [0, 160], sizes = [2, 32], strides = [1, 1]} : vector<2x256xf32> to vector<2x32xf32>
    %130 = vector.extract_strided_slice %118 {offsets = [0, 192], sizes = [2, 32], strides = [1, 1]} : vector<2x256xf32> to vector<2x32xf32>
    %131 = vector.extract_strided_slice %117 {offsets = [0, 224], sizes = [2, 32], strides = [1, 1]} : vector<2x256xf32> to vector<2x32xf32>
    %132 = arith.mulf %129, %102 : vector<2x32xf32>
    %133 = arith.mulf %128, %130 : vector<2x32xf32>
    %134 = arith.addf %132, %133 : vector<2x32xf32>
    %135 = math.tanh %134 : vector<2x32xf32>
    %136 = arith.mulf %131, %135 : vector<2x32xf32>
    %cst_33 = arith.constant 0.000000e+00 : f32
    %137 = vector.broadcast %cst_33 : f32 to vector<2x32xf32>
    %138 = arith.maximumf %136, %137 : vector<2x32xf32>
    %c4 = arith.constant 4 : index
    %c0_34 = arith.constant 0 : index
    %139 = vector.load %arg11[%c4, %c0_34] : memref<16x32xf32, #tpu.memory_space<vmem>>, vector<2x32xf32>
    tpu.vector_store %arg11[%c4, %c0_34], %138 {strides = array<i32>} : memref<16x32xf32, #tpu.memory_space<vmem>>, vector<2x32xf32>,
    %140 = tpu.concatenate %127, %136 in 1 : vector<2x32xf32>, vector<2x32xf32> -> vector<2x64xf32>
    %cst_35 = arith.constant dense<0.000000e+00> : vector<2x256xf32>
    %141 = tpu.matmul %140, %19, %cst_35 {dimension_numbers = #tpu.dot_dimension_numbers<[1], [0], [0], [1], [0, 0, 1, 1], [], []>} : vector<2x64xf32>, vector<64x256xf32>, vector<2x256xf32> -> vector<2x256xf32>
    %142 = vector.extract_strided_slice %18 {offsets = [4, 0, 0], sizes = [1, 2, 256], strides = [1, 1, 1]} : vector<8x2x256xf32> to vector<1x2x256xf32>
    %143 = vector.shape_cast %142 : vector<1x2x256xf32> to vector<2x256xf32>
    %144 = arith.addf %141, %143 : vector<2x256xf32>
    %145 = arith.negf %144 : vector<2x256xf32>
    %146 = math.exp %145 : vector<2x256xf32>
    %cst_36 = arith.constant 1.000000e+00 : f32
    %147 = vector.broadcast %cst_36 : f32 to vector<2x256xf32>
    %148 = arith.addf %147, %146 : vector<2x256xf32>
    %149 = arith.divf %147, %148 : vector<2x256xf32>
    %150 = math.tanh %144 : vector<2x256xf32>
    %151 = vector.extract_strided_slice %149 {offsets = [0, 0], sizes = [2, 32], strides = [1, 1]} : vector<2x256xf32> to vector<2x32xf32>
    %152 = vector.extract_strided_slice %149 {offsets = [0, 32], sizes = [2, 32], strides = [1, 1]} : vector<2x256xf32> to vector<2x32xf32>
    %153 = vector.extract_strided_slice %150 {offsets = [0, 64], sizes = [2, 32], strides = [1, 1]} : vector<2x256xf32> to vector<2x32xf32>
    %154 = vector.extract_strided_slice %149 {offsets = [0, 96], sizes = [2, 32], strides = [1, 1]} : vector<2x256xf32> to vector<2x32xf32>
    %155 = arith.mulf %152, %125 : vector<2x32xf32>
    %156 = arith.mulf %151, %153 : vector<2x32xf32>
    %157 = arith.addf %155, %156 : vector<2x32xf32>
    %158 = math.tanh %157 : vector<2x32xf32>
    %159 = arith.mulf %154, %158 : vector<2x32xf32>
    %160 = vector.extract_strided_slice %149 {offsets = [0, 128], sizes = [2, 32], strides = [1, 1]} : vector<2x256xf32> to vector<2x32xf32>
    %161 = vector.extract_strided_slice %149 {offsets = [0, 160], sizes = [2, 32], strides = [1, 1]} : vector<2x256xf32> to vector<2x32xf32>
    %162 = vector.extract_strided_slice %150 {offsets = [0, 192], sizes = [2, 32], strides = [1, 1]} : vector<2x256xf32> to vector<2x32xf32>
    %163 = vector.extract_strided_slice %149 {offsets = [0, 224], sizes = [2, 32], strides = [1, 1]} : vector<2x256xf32> to vector<2x32xf32>
    %164 = arith.mulf %161, %134 : vector<2x32xf32>
    %165 = arith.mulf %160, %162 : vector<2x32xf32>
    %166 = arith.addf %164, %165 : vector<2x32xf32>
    %167 = math.tanh %166 : vector<2x32xf32>
    %168 = arith.mulf %163, %167 : vector<2x32xf32>
    %cst_37 = arith.constant 0.000000e+00 : f32
    %169 = vector.broadcast %cst_37 : f32 to vector<2x32xf32>
    %170 = arith.maximumf %168, %169 : vector<2x32xf32>
    %c6 = arith.constant 6 : index
    %c0_38 = arith.constant 0 : index
    %171 = vector.load %arg11[%c6, %c0_38] : memref<16x32xf32, #tpu.memory_space<vmem>>, vector<2x32xf32>
    tpu.vector_store %arg11[%c6, %c0_38], %170 {strides = array<i32>} : memref<16x32xf32, #tpu.memory_space<vmem>>, vector<2x32xf32>,
    %172 = tpu.concatenate %159, %168 in 1 : vector<2x32xf32>, vector<2x32xf32> -> vector<2x64xf32>
    %cst_39 = arith.constant dense<0.000000e+00> : vector<2x256xf32>
    %173 = tpu.matmul %172, %19, %cst_39 {dimension_numbers = #tpu.dot_dimension_numbers<[1], [0], [0], [1], [0, 0, 1, 1], [], []>} : vector<2x64xf32>, vector<64x256xf32>, vector<2x256xf32> -> vector<2x256xf32>
    %174 = vector.extract_strided_slice %18 {offsets = [5, 0, 0], sizes = [1, 2, 256], strides = [1, 1, 1]} : vector<8x2x256xf32> to vector<1x2x256xf32>
    %175 = vector.shape_cast %174 : vector<1x2x256xf32> to vector<2x256xf32>
    %176 = arith.addf %173, %175 : vector<2x256xf32>
    %177 = arith.negf %176 : vector<2x256xf32>
    %178 = math.exp %177 : vector<2x256xf32>
    %cst_40 = arith.constant 1.000000e+00 : f32
    %179 = vector.broadcast %cst_40 : f32 to vector<2x256xf32>
    %180 = arith.addf %179, %178 : vector<2x256xf32>
    %181 = arith.divf %179, %180 : vector<2x256xf32>
    %182 = math.tanh %176 : vector<2x256xf32>
    %183 = vector.extract_strided_slice %181 {offsets = [0, 0], sizes = [2, 32], strides = [1, 1]} : vector<2x256xf32> to vector<2x32xf32>
    %184 = vector.extract_strided_slice %181 {offsets = [0, 32], sizes = [2, 32], strides = [1, 1]} : vector<2x256xf32> to vector<2x32xf32>
    %185 = vector.extract_strided_slice %182 {offsets = [0, 64], sizes = [2, 32], strides = [1, 1]} : vector<2x256xf32> to vector<2x32xf32>
    %186 = vector.extract_strided_slice %181 {offsets = [0, 96], sizes = [2, 32], strides = [1, 1]} : vector<2x256xf32> to vector<2x32xf32>
    %187 = arith.mulf %184, %157 : vector<2x32xf32>
    %188 = arith.mulf %183, %185 : vector<2x32xf32>
    %189 = arith.addf %187, %188 : vector<2x32xf32>
    %190 = math.tanh %189 : vector<2x32xf32>
    %191 = arith.mulf %186, %190 : vector<2x32xf32>
    %192 = vector.extract_strided_slice %181 {offsets = [0, 128], sizes = [2, 32], strides = [1, 1]} : vector<2x256xf32> to vector<2x32xf32>
    %193 = vector.extract_strided_slice %181 {offsets = [0, 160], sizes = [2, 32], strides = [1, 1]} : vector<2x256xf32> to vector<2x32xf32>
    %194 = vector.extract_strided_slice %182 {offsets = [0, 192], sizes = [2, 32], strides = [1, 1]} : vector<2x256xf32> to vector<2x32xf32>
    %195 = vector.extract_strided_slice %181 {offsets = [0, 224], sizes = [2, 32], strides = [1, 1]} : vector<2x256xf32> to vector<2x32xf32>
    %196 = arith.mulf %193, %166 : vector<2x32xf32>
    %197 = arith.mulf %192, %194 : vector<2x32xf32>
    %198 = arith.addf %196, %197 : vector<2x32xf32>
    %199 = math.tanh %198 : vector<2x32xf32>
    %200 = arith.mulf %195, %199 : vector<2x32xf32>
    %cst_41 = arith.constant 0.000000e+00 : f32
    %201 = vector.broadcast %cst_41 : f32 to vector<2x32xf32>
    %202 = arith.maximumf %200, %201 : vector<2x32xf32>
    %c8 = arith.constant 8 : index
    %c0_42 = arith.constant 0 : index
    %203 = vector.load %arg11[%c8, %c0_42] : memref<16x32xf32, #tpu.memory_space<vmem>>, vector<2x32xf32>
    tpu.vector_store %arg11[%c8, %c0_42], %202 {strides = array<i32>} : memref<16x32xf32, #tpu.memory_space<vmem>>, vector<2x32xf32>,
    %204 = tpu.concatenate %191, %200 in 1 : vector<2x32xf32>, vector<2x32xf32> -> vector<2x64xf32>
    %cst_43 = arith.constant dense<0.000000e+00> : vector<2x256xf32>
    %205 = tpu.matmul %204, %19, %cst_43 {dimension_numbers = #tpu.dot_dimension_numbers<[1], [0], [0], [1], [0, 0, 1, 1], [], []>} : vector<2x64xf32>, vector<64x256xf32>, vector<2x256xf32> -> vector<2x256xf32>
    %206 = vector.extract_strided_slice %18 {offsets = [6, 0, 0], sizes = [1, 2, 256], strides = [1, 1, 1]} : vector<8x2x256xf32> to vector<1x2x256xf32>
    %207 = vector.shape_cast %206 : vector<1x2x256xf32> to vector<2x256xf32>
    %208 = arith.addf %205, %207 : vector<2x256xf32>
    %209 = arith.negf %208 : vector<2x256xf32>
    %210 = math.exp %209 : vector<2x256xf32>
    %cst_44 = arith.constant 1.000000e+00 : f32
    %211 = vector.broadcast %cst_44 : f32 to vector<2x256xf32>
    %212 = arith.addf %211, %210 : vector<2x256xf32>
    %213 = arith.divf %211, %212 : vector<2x256xf32>
    %214 = math.tanh %208 : vector<2x256xf32>
    %215 = vector.extract_strided_slice %213 {offsets = [0, 0], sizes = [2, 32], strides = [1, 1]} : vector<2x256xf32> to vector<2x32xf32>
    %216 = vector.extract_strided_slice %213 {offsets = [0, 32], sizes = [2, 32], strides = [1, 1]} : vector<2x256xf32> to vector<2x32xf32>
    %217 = vector.extract_strided_slice %214 {offsets = [0, 64], sizes = [2, 32], strides = [1, 1]} : vector<2x256xf32> to vector<2x32xf32>
    %218 = vector.extract_strided_slice %213 {offsets = [0, 96], sizes = [2, 32], strides = [1, 1]} : vector<2x256xf32> to vector<2x32xf32>
    %219 = arith.mulf %216, %189 : vector<2x32xf32>
    %220 = arith.mulf %215, %217 : vector<2x32xf32>
    %221 = arith.addf %219, %220 : vector<2x32xf32>
    %222 = math.tanh %221 : vector<2x32xf32>
    %223 = arith.mulf %218, %222 : vector<2x32xf32>
    %224 = vector.extract_strided_slice %213 {offsets = [0, 128], sizes = [2, 32], strides = [1, 1]} : vector<2x256xf32> to vector<2x32xf32>
    %225 = vector.extract_strided_slice %213 {offsets = [0, 160], sizes = [2, 32], strides = [1, 1]} : vector<2x256xf32> to vector<2x32xf32>
    %226 = vector.extract_strided_slice %214 {offsets = [0, 192], sizes = [2, 32], strides = [1, 1]} : vector<2x256xf32> to vector<2x32xf32>
    %227 = vector.extract_strided_slice %213 {offsets = [0, 224], sizes = [2, 32], strides = [1, 1]} : vector<2x256xf32> to vector<2x32xf32>
    %228 = arith.mulf %225, %198 : vector<2x32xf32>
    %229 = arith.mulf %224, %226 : vector<2x32xf32>
    %230 = arith.addf %228, %229 : vector<2x32xf32>
    %231 = math.tanh %230 : vector<2x32xf32>
    %232 = arith.mulf %227, %231 : vector<2x32xf32>
    %cst_45 = arith.constant 0.000000e+00 : f32
    %233 = vector.broadcast %cst_45 : f32 to vector<2x32xf32>
    %234 = arith.maximumf %232, %233 : vector<2x32xf32>
    %c10 = arith.constant 10 : index
    %c0_46 = arith.constant 0 : index
    %235 = vector.load %arg11[%c10, %c0_46] : memref<16x32xf32, #tpu.memory_space<vmem>>, vector<2x32xf32>
    tpu.vector_store %arg11[%c10, %c0_46], %234 {strides = array<i32>} : memref<16x32xf32, #tpu.memory_space<vmem>>, vector<2x32xf32>,
    %236 = tpu.concatenate %223, %232 in 1 : vector<2x32xf32>, vector<2x32xf32> -> vector<2x64xf32>
    %cst_47 = arith.constant dense<0.000000e+00> : vector<2x256xf32>
    %237 = tpu.matmul %236, %19, %cst_47 {dimension_numbers = #tpu.dot_dimension_numbers<[1], [0], [0], [1], [0, 0, 1, 1], [], []>} : vector<2x64xf32>, vector<64x256xf32>, vector<2x256xf32> -> vector<2x256xf32>
    %238 = vector.extract_strided_slice %18 {offsets = [7, 0, 0], sizes = [1, 2, 256], strides = [1, 1, 1]} : vector<8x2x256xf32> to vector<1x2x256xf32>
    %239 = vector.shape_cast %238 : vector<1x2x256xf32> to vector<2x256xf32>
    %240 = arith.addf %237, %239 : vector<2x256xf32>
    %241 = arith.negf %240 : vector<2x256xf32>
    %242 = math.exp %241 : vector<2x256xf32>
    %cst_48 = arith.constant 1.000000e+00 : f32
    %243 = vector.broadcast %cst_48 : f32 to vector<2x256xf32>
    %244 = arith.addf %243, %242 : vector<2x256xf32>
    %245 = arith.divf %243, %244 : vector<2x256xf32>
    %246 = math.tanh %240 : vector<2x256xf32>
    %247 = vector.extract_strided_slice %245 {offsets = [0, 0], sizes = [2, 32], strides = [1, 1]} : vector<2x256xf32> to vector<2x32xf32>
    %248 = vector.extract_strided_slice %245 {offsets = [0, 32], sizes = [2, 32], strides = [1, 1]} : vector<2x256xf32> to vector<2x32xf32>
    %249 = vector.extract_strided_slice %246 {offsets = [0, 64], sizes = [2, 32], strides = [1, 1]} : vector<2x256xf32> to vector<2x32xf32>
    %250 = vector.extract_strided_slice %245 {offsets = [0, 96], sizes = [2, 32], strides = [1, 1]} : vector<2x256xf32> to vector<2x32xf32>
    %251 = arith.mulf %248, %221 : vector<2x32xf32>
    %252 = arith.mulf %247, %249 : vector<2x32xf32>
    %253 = arith.addf %251, %252 : vector<2x32xf32>
    %254 = math.tanh %253 : vector<2x32xf32>
    %255 = arith.mulf %250, %254 : vector<2x32xf32>
    %256 = vector.extract_strided_slice %245 {offsets = [0, 128], sizes = [2, 32], strides = [1, 1]} : vector<2x256xf32> to vector<2x32xf32>
    %257 = vector.extract_strided_slice %245 {offsets = [0, 160], sizes = [2, 32], strides = [1, 1]} : vector<2x256xf32> to vector<2x32xf32>
    %258 = vector.extract_strided_slice %246 {offsets = [0, 192], sizes = [2, 32], strides = [1, 1]} : vector<2x256xf32> to vector<2x32xf32>
    %259 = vector.extract_strided_slice %245 {offsets = [0, 224], sizes = [2, 32], strides = [1, 1]} : vector<2x256xf32> to vector<2x32xf32>
    %260 = arith.mulf %257, %230 : vector<2x32xf32>
    %261 = arith.mulf %256, %258 : vector<2x32xf32>
    %262 = arith.addf %260, %261 : vector<2x32xf32>
    %263 = math.tanh %262 : vector<2x32xf32>
    %264 = arith.mulf %259, %263 : vector<2x32xf32>
    %cst_49 = arith.constant 0.000000e+00 : f32
    %265 = vector.broadcast %cst_49 : f32 to vector<2x32xf32>
    %266 = arith.maximumf %264, %265 : vector<2x32xf32>
    %c12 = arith.constant 12 : index
    %c0_50 = arith.constant 0 : index
    %267 = vector.load %arg11[%c12, %c0_50] : memref<16x32xf32, #tpu.memory_space<vmem>>, vector<2x32xf32>
    tpu.vector_store %arg11[%c12, %c0_50], %266 {strides = array<i32>} : memref<16x32xf32, #tpu.memory_space<vmem>>, vector<2x32xf32>,
    %268 = tpu.concatenate %255, %264 in 1 : vector<2x32xf32>, vector<2x32xf32> -> vector<2x64xf32>
    %cst_51 = arith.constant dense<0.000000e+00> : vector<2x256xf32>
    %269 = tpu.matmul %268, %19, %cst_51 {dimension_numbers = #tpu.dot_dimension_numbers<[1], [0], [0], [1], [0, 0, 1, 1], [], []>} : vector<2x64xf32>, vector<64x256xf32>, vector<2x256xf32> -> vector<2x256xf32>
    %270 = vector.extract_strided_slice %18 {offsets = [7, 0, 0], sizes = [1, 2, 256], strides = [1, 1, 1]} : vector<8x2x256xf32> to vector<1x2x256xf32>
    %271 = vector.shape_cast %270 : vector<1x2x256xf32> to vector<2x256xf32>
    %272 = arith.addf %269, %271 : vector<2x256xf32>
    %273 = arith.negf %272 : vector<2x256xf32>
    %274 = math.exp %273 : vector<2x256xf32>
    %cst_52 = arith.constant 1.000000e+00 : f32
    %275 = vector.broadcast %cst_52 : f32 to vector<2x256xf32>
    %276 = arith.addf %275, %274 : vector<2x256xf32>
    %277 = arith.divf %275, %276 : vector<2x256xf32>
    %278 = math.tanh %272 : vector<2x256xf32>
    %279 = vector.extract_strided_slice %277 {offsets = [0, 128], sizes = [2, 32], strides = [1, 1]} : vector<2x256xf32> to vector<2x32xf32>
    %280 = vector.extract_strided_slice %277 {offsets = [0, 160], sizes = [2, 32], strides = [1, 1]} : vector<2x256xf32> to vector<2x32xf32>
    %281 = vector.extract_strided_slice %278 {offsets = [0, 192], sizes = [2, 32], strides = [1, 1]} : vector<2x256xf32> to vector<2x32xf32>
    %282 = vector.extract_strided_slice %277 {offsets = [0, 224], sizes = [2, 32], strides = [1, 1]} : vector<2x256xf32> to vector<2x32xf32>
    %283 = arith.mulf %280, %262 : vector<2x32xf32>
    %284 = arith.mulf %279, %281 : vector<2x32xf32>
    %285 = arith.addf %283, %284 : vector<2x32xf32>
    %286 = math.tanh %285 : vector<2x32xf32>
    %287 = arith.mulf %282, %286 : vector<2x32xf32>
    %cst_53 = arith.constant 0.000000e+00 : f32
    %288 = vector.broadcast %cst_53 : f32 to vector<2x32xf32>
    %289 = arith.maximumf %287, %288 : vector<2x32xf32>
    %c14 = arith.constant 14 : index
    %c0_54 = arith.constant 0 : index
    %290 = vector.load %arg11[%c14, %c0_54] : memref<16x32xf32, #tpu.memory_space<vmem>>, vector<2x32xf32>
    tpu.vector_store %arg11[%c14, %c0_54], %289 {strides = array<i32>} : memref<16x32xf32, #tpu.memory_space<vmem>>, vector<2x32xf32>,
    %c0_55 = arith.constant 0 : index
    %c0_56 = arith.constant 0 : index
    %291 = vector.load %arg11[%c0_55, %c0_56] : memref<16x32xf32, #tpu.memory_space<vmem>>, vector<16x32xf32>
    %c0_57 = arith.constant 0 : index
    %c0_58 = arith.constant 0 : index
    %292 = vector.load %arg7[%c0_57, %c0_58] : memref<32x8xf32, #tpu.memory_space<vmem>>, vector<32x8xf32>
    %cst_59 = arith.constant dense<0.000000e+00> : vector<16x8xf32>
    %293 = tpu.matmul %291, %292, %cst_59 {dimension_numbers = #tpu.dot_dimension_numbers<[1], [0], [0], [1], [0, 0, 1, 1], [], []>} : vector<16x32xf32>, vector<32x8xf32>, vector<16x8xf32> -> vector<16x8xf32>
    %c0_60 = arith.constant 0 : index
    %c0_61 = arith.constant 0 : index
    %294 = vector.load %arg8[%c0_60, %c0_61] : memref<1x8xf32, #tpu.memory_space<vmem>>, vector<1x8xf32>
    %295 = vector.broadcast %294 : vector<1x8xf32> to vector<16x8xf32>
    %296 = arith.addf %293, %295 : vector<16x8xf32>
    %c0_62 = arith.constant 0 : index
    %c0_63 = arith.constant 0 : index
    %297 = vector.load %arg9[%c0_62, %c0_63] : memref<16x8xf32, #tpu.memory_space<vmem>>, vector<16x8xf32>
    tpu.vector_store %arg9[%c0_62, %c0_63], %296 {strides = array<i32>} : memref<16x8xf32, #tpu.memory_space<vmem>>, vector<16x8xf32>,
    %c0_64 = arith.constant 0 : index
    %c0_65 = arith.constant 0 : index
    %298 = vector.load %arg10[%c0_64, %c0_65] : memref<8x32xf32, #tpu.memory_space<vmem>>, vector<2x32xf32>
    tpu.vector_store %arg10[%c0_64, %c0_65], %255 {strides = array<i32>} : memref<8x32xf32, #tpu.memory_space<vmem>>, vector<2x32xf32>,
    %c4_66 = arith.constant 4 : index
    %c0_67 = arith.constant 0 : index
    %299 = vector.load %arg10[%c4_66, %c0_67] : memref<8x32xf32, #tpu.memory_space<vmem>>, vector<2x32xf32>
    tpu.vector_store %arg10[%c4_66, %c0_67], %253 {strides = array<i32>} : memref<8x32xf32, #tpu.memory_space<vmem>>, vector<2x32xf32>,
    %c2_68 = arith.constant 2 : index
    %c0_69 = arith.constant 0 : index
    %300 = vector.load %arg10[%c2_68, %c0_69] : memref<8x32xf32, #tpu.memory_space<vmem>>, vector<2x32xf32>
    tpu.vector_store %arg10[%c2_68, %c0_69], %287 {strides = array<i32>} : memref<8x32xf32, #tpu.memory_space<vmem>>, vector<2x32xf32>,
    %c6_70 = arith.constant 6 : index
    %c0_71 = arith.constant 0 : index
    %301 = vector.load %arg10[%c6_70, %c0_71] : memref<8x32xf32, #tpu.memory_space<vmem>>, vector<2x32xf32>
    tpu.vector_store %arg10[%c6_70, %c0_71], %285 {strides = array<i32>} : memref<8x32xf32, #tpu.memory_space<vmem>>, vector<2x32xf32>,
    return
  }
}

</mosaic_0001>

<bundles_post_ra>
// kernel: model_forward.1
= control target key start
LH: loop header
LB: loop body
LE: loop exit
PB: predicated region body
PF: predicated region fallthrough
CT: control target
= control target key end

     0   :  { %v66_v0 = vlaneseq  ;;  %v1841_v3 = vmov 1983009808   ;;  %vm95_vm0 = vcmask 261120   ;;  %v1842_v48 = vmov 0.0   ;;  %s1843_s14 = smov 64   ;;  %s1845_s17 = smov 96   ;;  %s2435_s1 = inlined_call_operand.vmem [shape: f32[32,32], index: 1, kind: input, shape index: {}]   ;;  %s2436_s0 = inlined_call_operand.vmem [shape: f32[8,2,32], index: 0, kind: input, shape index: {}]   ;;  %s2437_s5 = inlined_call_operand.vmem [shape: f32[64,256], index: 5, kind: input, shape index: {}]   ;;  %s2438_s3 = inlined_call_operand.vmem [shape: f32[32,128], index: 3, kind: input, shape index: {}]   ;;  %s2439_s2 = inlined_call_operand.vmem [shape: f32[1,32], index: 2, kind: input, shape index: {}]   ;;  %s2440_s4 = inlined_call_operand.vmem [shape: f32[1,128], index: 4, kind: input, shape index: {}]   ;;  %s2441_s6 = inlined_call_operand.vmem [shape: f32[1,128], index: 6, kind: input, shape index: {}]   ;;  %s2442_s10 = inlined_call_operand.vmem [shape: f32[8,32], index: 10, kind: output, shape index: {1}]   ;;  %s2443_s7 = inlined_call_operand.vmem [shape: f32[32,8], index: 7, kind: input, shape index: {}]   ;;  %s2444_s8 = inlined_call_operand.vmem [shape: f32[1,8], index: 8, kind: input, shape index: {}]   ;;  %s2445_s9 = inlined_call_operand.vmem [shape: f32[16,8], index: 9, kind: output, shape index: {0}]  }
   0x1   :  { %v45_v1 = vld [vmem:[%s2435_s1 + $0x18] sm:$0xff]  ;;  %v44_v2 = vld [vmem:[%s2435_s1 + $0x10] sm:$0xff]  ;;  %v64_v4 = vunpack.c.l.s4 %v1841_v3  ;;  %v43_v5 = vld [vmem:[%s2435_s1 + $0x8] sm:$0xff]  ;;  %vm336_vm1 = vcmask 523264   ;;  %vm566_vm2 = vcmask 254976   ;;  %vm1596_vm3 = vcmask 64512  }
   0x2   :  { %1675 = vmatprep.subr.mxu0 %v45_v1  ;;  %v34_v6 = vld [vmem:[%s2436_s0] sm:$0x3]  ;;  %v35_v7 = vld [vmem:[%s2436_s0 + $0x2] sm:$0x3]  ;;  %v67_v8 = vshrl.u32 %v66_v0, 7  ;;  %v1946_v26 = vld [vmem:[%s2437_s5 + $0x78] sm:$0xff] }
   0x3   :  { %1676 = vmatpush3.msra.mxu0 %v45_v1  ;;  %v36_v9 = vld [vmem:[%s2436_s0 + $0x4] sm:$0x3]  ;;  %v37_v10 = vld [vmem:[%s2436_s0 + $0x6] sm:$0x3]  ;;  %v61_v11 = vcombine.low %v34_v6, %v35_v7  ;;  %v65_v12 = vunpack.c.0.s8 %v64_v4  ;;  %v38_v13 = vld [vmem:[%s2436_s0 + $0x8] sm:$0x3] }
   0x4   :  { %1677 = vmatprep.subr.mxu0 %v44_v2  ;;  %v62_v14 = vcombine.low %v36_v9, %v37_v10  ;;  %v39_v15 = vld [vmem:[%s2436_s0 + $0xa] sm:$0x3]  ;;  %v40_v16 = vld [vmem:[%s2436_s0 + $0xc] sm:$0x3]  ;;  %v41_v17 = vld [vmem:[%s2436_s0 + $0xe] sm:$0x3] }
   0x5   :  { %1678 = vmatpush3.msra.mxu0 %v44_v2  ;;  %v42_v18 = vld [vmem:[%s2435_s1] sm:$0xff]  ;;  %v1937_v19 = vsub.s32 %v65_v12, %v67_v8  ;;  %v78_v20 = vcombine.low %v38_v13, %v39_v15  ;;  %v79_v21 = vcombine.low %v40_v16, %v41_v17  ;;  %v1952_v29 = vld [vmem:[%s2437_s5 + $0x70] sm:$0xff]  ;;  %v1958_v30 = vld [vmem:[%s2437_s5 + $0x68] sm:$0xff] }
   0x6   :  { %1679 = vmatprep.subr.mxu0 %v43_v5  ;;  %v1964_v31 = vld [vmem:[%s2437_s5 + $0x60] sm:$0xff]  ;;  %v180_v32 = vld [vmem:[%s2438_s3 + $0x18] sm:$0xff]  ;;  %v1981_v34 = vld [vmem:[%s2437_s5 + $0x50] sm:$0xff] }
   0x7   :  { %1680 = vmatpush3.msra.mxu0 %v43_v5  ;;  %v69_v22 = vrot.slane %v61_v11, %v1937_v19  ;;  %v76_v23 = vrot.slane %v62_v14, %v1937_v19  ;;  %v86_v24 = vrot.slane %v78_v20, %v1937_v19  ;;  %v93_v25 = vrot.slane %v79_v21, %v1937_v19  ;;  %v1975_v33 = vld [vmem:[%s2437_s5 + $0x58] sm:$0xff]  ;;  %v179_v35 = vld [vmem:[%s2438_s3 + $0x10] sm:$0xff]  ;;  %v1990_v36 = vld [vmem:[%s2437_s5 + $0x48] sm:$0xff] }
   0x8   :  { %1681 = vmatprep.subr.mxu0 %v42_v18  ;;  %1686 = vmatprep.subr.mxu1 %v180_v32  ;;  %v1996_v37 = vld [vmem:[%s2437_s5 + $0x40] sm:$0xff]  ;;  %v178_v38 = vld [vmem:[%s2438_s3 + $0x8] sm:$0xff]  ;;  %v2005_v39 = vld [vmem:[%s2437_s5 + $0x38] sm:$0xff] }
   0x9   :  { %1682 = vmatpush3.msra.mxu0 %v42_v18  ;;  %v77_v27 = vcombine.low %v69_v22, %v76_v23  ;;  %v94_v28 = vcombine.low %v86_v24, %v93_v25  ;;  %1687 = vmatpush3.msra.mxu1 %v180_v32  ;;  %v2011_v40 = vld [vmem:[%s2437_s5 + $0x30] sm:$0xff]  ;;  %v177_v41 = vld [vmem:[%s2438_s3] sm:$0xff]  ;;  %v2020_v42 = vld [vmem:[%s2437_s5 + $0x28] sm:$0xff] }
   0xa   :  { %356 = vmatprep.subr.mxu0 %v1946_v26  ;;  %1688 = vmatprep.subr.mxu1 %v179_v35  ;;  %v2026_v43 = vld [vmem:[%s2437_s5 + $0x20] sm:$0xff]  ;;  %v2032_v44 = vld [vmem:[%s2437_s5 + $0x18] sm:$0xff]  ;;  %v2038_v45 = vld [vmem:[%s2437_s5 + $0x10] sm:$0xff] }
   0xb   :  { %1683 = vmatprep.mubr.msk.f32.mxu0 %vm95_vm0, %v77_v27  ;;  %1689 = vmatpush3.msra.mxu1 %v179_v35  ;;  %v2043_v46 = vld [vmem:[%s2437_s5 + $0x8] sm:$0xff]  ;;  %v2048_v47 = vld [vmem:[%s2437_s5] sm:$0xff] }
   0xc   :  { %1684 = vmatmul.mubr.msk.f32.vlgmr.msra.gmra.mxu0 %vm95_vm0, %v94_v28  ;;  %1690 = vmatprep.subr.mxu1 %v178_v38  ;;  %v1623_v49 = vld [vmem:[%s2439_s2] ss:$0 sm:$0xff] }
   0xd   :  { %357 = vmatpush1.msra.mxu0 %v1952_v29  ;;  %1691 = vmatpush3.msra.mxu1 %v178_v38  ;;  %v1626_v58 = vld [vmem:[%s2440_s4] ss:$0 sm:$0xff]  ;;  %s1844_s4 = smov 32  }
   0xe   :  { %358 = vmatprep.subr.mxu0 %v1958_v30  ;;  %1692 = vmatprep.subr.mxu1 %v177_v41  ;;  %v2131_v18 = vld [vmem:[%s2441_s6] ss:$0 sm:$0xff] }
   0xf   :  { %359 = vmatpush1.msra.mxu0 %v1964_v31  ;;  %1693 = vmatpush3.msra.mxu1 %v177_v41 }
  0x10   :  { %360 = vmatprep.subr.mxu0 %v1975_v33  ;;  %458 = vmatprep.subr.mxu1 %v1946_v26 }
  0x11   :  { %361 = vmatpush1.msra.mxu0 %v1981_v34  ;;  %404 = vmatprep.mubr.f32.mxu0 %v1842_v48 }
  0x12   :  { %362 = vmatprep.subr.mxu0 %v1990_v36 }
  0x13   :  { %363 = vmatpush1.msra.mxu0 %v1996_v37 }
  0x14   :  { %364 = vmatprep.subr.mxu0 %v2005_v39 }
  0x15   :  { %365 = vmatpush1.msra.mxu0 %v2011_v40 }
  0x16   :  { %366 = vmatprep.subr.mxu0 %v2020_v42 }
  0x17   :  { %367 = vmatpush1.msra.mxu0 %v2026_v43 }
  0x18   :  { %368 = vmatprep.subr.mxu0 %v2032_v44 }
  0x19   :  { %369 = vmatpush1.msra.mxu0 %v2038_v45 }
  0x1a   :  { %370 = vmatprep.subr.mxu0 %v2043_v46 }
  0x1b   :  { %371 = vmatpush1.msra.mxu0 %v2048_v47 }
  0x1c   :  { %405 = vmatmul.mubr.f32.vlgmr.msra.gmra.mxu0 %v1842_v48  ;;  %596 = vmatprep.subr.mxu0 %v1946_v26 }
  0x1d   :  { %597 = vmatpush1.msra.mxu0 %v1952_v29  ;;  %644 = vmatprep.mubr.f32.mxu0 %v1842_v48 }
  0x1e   :  { %598 = vmatprep.subr.mxu0 %v1958_v30 }
  0x1f   :  { %599 = vmatpush1.msra.mxu0 %v1964_v31 }
  0x20   :  { %600 = vmatprep.subr.mxu0 %v1975_v33 }
  0x21   :  { %601 = vmatpush1.msra.mxu0 %v1981_v34 }
  0x22   :  { %602 = vmatprep.subr.mxu0 %v1990_v36 }
  0x23   :  { %603 = vmatpush1.msra.mxu0 %v1996_v37 }
  0x24   :  { %604 = vmatprep.subr.mxu0 %v2005_v39 }
  0x25   :  { %605 = vmatpush1.msra.mxu0 %v2011_v40 }
  0x26   :  { %606 = vmatprep.subr.mxu0 %v2020_v42 }
  0x27   :  { %607 = vmatpush1.msra.mxu0 %v2026_v43 }
  0x28   :  { %608 = vmatprep.subr.mxu0 %v2032_v44 }
  0x29   :  { %609 = vmatpush1.msra.mxu0 %v2038_v45 }
  0x2a   :  { %610 = vmatprep.subr.mxu0 %v2043_v46 }
  0x2b   :  { %611 = vmatpush1.msra.mxu0 %v2048_v47 }
  0x2c   :  { %870 = vmatprep.subr.mxu0 %v1946_v26 }
  0xcc   :  { %v1685_v50 = vpop.f32.mrf.mxu0 }
  0xcd   :  { %v172_v51 = vadd.f32 %v1685_v50, %v1623_v49 }
  0xce   :  { %v166_v52 = vpop.f32.mrf.mxu0 }
  0xcf   :  { %v167_v53 = vadd.f32 %v1623_v49, %v166_v52  ;;  %v176_v55 = vmax.f32 %v172_v51, 0.0 }
  0xd1   :  { %v175_v54 = vmax.f32 %v167_v53, 0.0 }
  0xd3   :  { %1694 = vmatprep.mubr.msk.f32.mxu1 %vm95_vm0, %v175_v54 }
  0xd4   :  { %1695 = vmatmul.mubr.msk.f32.vlgmr.msra.gmra.mxu1 %vm95_vm0, %v176_v55 }
  0xd5   :  { %459 = vmatpush1.msra.mxu1 %v1952_v29  ;;  %506 = vmatprep.mubr.f32.mxu1 %v1842_v48 }
  0xd6   :  { %460 = vmatprep.subr.mxu1 %v1958_v30 }
  0xd7   :  { %461 = vmatpush1.msra.mxu1 %v1964_v31 }
  0xd8   :  { %462 = vmatprep.subr.mxu1 %v1975_v33 }
  0xd9   :  { %463 = vmatpush1.msra.mxu1 %v1981_v34 }
  0xda   :  { %464 = vmatprep.subr.mxu1 %v1990_v36 }
  0xdb   :  { %465 = vmatpush1.msra.mxu1 %v1996_v37 }
  0xdc   :  { %466 = vmatprep.subr.mxu1 %v2005_v39  ;;  %v406_v56 = vpop.f32.mrf.mxu0 }
  0xdd   :  { %467 = vmatpush1.msra.mxu1 %v2011_v40 }
  0xde   :  { %468 = vmatprep.subr.mxu1 %v2020_v42  ;;  %v408_v57 = vpop.f32.mrf.mxu0 }
  0xdf   :  { %469 = vmatpush1.msra.mxu1 %v2026_v43 }
  0xe0   :  { %470 = vmatprep.subr.mxu1 %v2032_v44 }
  0xe1   :  { %471 = vmatpush1.msra.mxu1 %v2038_v45 }
  0xe2   :  { %472 = vmatprep.subr.mxu1 %v2043_v46 }
  0xe3   :  { %473 = vmatpush1.msra.mxu1 %v2048_v47 }
  0xe4   :  { %733 = vmatprep.subr.mxu1 %v1946_v26 }
 0x194   :  { %v1696_v59 = vpop.f32.mrf.mxu1 }
 0x195   :  { %v2099_v60 = vadd.f32 %v1696_v59, %v1626_v58 }
 0x196   :  { %v260_v61 = vpop.f32.mrf.mxu1 }
 0x197   :  { %v2101_v62 = vadd.f32 %v1626_v58, %v260_v61 }
 0x199   :  { %v278_v63 = vrot.slane %v2101_v62, %v1937_v19 }
 0x19b   :  { %v407_v0 = vadd.f32 %v406_v56, %v278_v63  ;;  %v286_v16 = vcombine.high %v278_v63, %v278_v63 }
 0x19d   :  { %1713 = vtanh.f32 %v407_v0  ;;  %v1630_v2 = vmul.f32 -1.442695, %v407_v0 }
 0x19f   :  { %1715 = vpow2.f32 %v1630_v2 }
 0x1aa   :  { %v1714_v1 = vpop.eup %1713 }
 0x1ab   :  { %419 = vrot.lane.b32.xlu0 %v1714_v1, %s1843_s14 }
 0x1ac   :  { %v1716_v3 = vpop.eup %1715 }
 0x1ad   :  { %v413_v4 = vadd.f32 1.0, %v1716_v3 }
 0x1af   :  { %1717 = vrcp.f32 %v413_v4 }
 0x1bc   :  { %v1718_v5 = vpop.eup %1717 }
 0x1bd   :  { %v417_v8 = vmul.f32 0.0, %v1718_v5 }
 0x21d   :  { %v420_v6 = vpop.permute.xlu0 %419 }
 0x21e   :  { %v422_v7 = vmul.f32 %v1718_v5, %v420_v6 }
 0x220   :  { %424 = vrot.lane.b32.xlu0 %v422_v7, %s1844_s4  ;;  %v271_v7 = vcombine.high %v2101_v62, %v2101_v62 }
 0x292   :  { %v425_v9 = vpop.permute.xlu0 %424 }
 0x293   :  { %v427_v10 = vadd.f32 %v425_v9, %v417_v8  ;;  %v2173_v8 = vrot.slane %v271_v7, %v1937_v19 }
 0x295   :  { %1719 = vtanh.f32 %v427_v10 }
 0x2a2   :  { %v1720_v11 = vpop.eup %1719 }
 0x2a3   :  { %430 = vrot.lane.b32.xlu1 %v1720_v11, %s1843_s14 }
 0x315   :  { %v431_v12 = vpop.permute.xlu1 %430 }
 0x316   :  { %v433_v13 = vmul.f32 %v1718_v5, %v431_v12 }
 0x318   :  { %435 = vrot.lane.b32.xlu1 %v433_v13, %s1844_s4 }
 0x38a   :  { %v436_v14 = vpop.permute.xlu1 %435 }
 0x38b   :  { %v438_v15 = vsel %vm95_vm0, %v436_v14, 0.0 }
 0x38c   :  { %1631 = vmatmul.mubr.msk.f32.vlgmr.msra.gmra.mxu1 %vm336_vm1, %v438_v15 }
 0x38d   :  { %734 = vmatpush1.msra.mxu1 %v1952_v29  ;;  %781 = vmatprep.mubr.f32.mxu1 %v1842_v48 }
 0x38e   :  { %735 = vmatprep.subr.mxu1 %v1958_v30 }
 0x38f   :  { %736 = vmatpush1.msra.mxu1 %v1964_v31 }
 0x390   :  { %737 = vmatprep.subr.mxu1 %v1975_v33 }
 0x391   :  { %738 = vmatpush1.msra.mxu1 %v1981_v34 }
 0x392   :  { %739 = vmatprep.subr.mxu1 %v1990_v36 }
 0x393   :  { %740 = vmatpush1.msra.mxu1 %v1996_v37 }
 0x394   :  { %741 = vmatprep.subr.mxu1 %v2005_v39 }
 0x395   :  { %742 = vmatpush1.msra.mxu1 %v2011_v40 }
 0x396   :  { %743 = vmatprep.subr.mxu1 %v2020_v42 }
 0x397   :  { %744 = vmatpush1.msra.mxu1 %v2026_v43 }
 0x398   :  { %745 = vmatprep.subr.mxu1 %v2032_v44 }
 0x399   :  { %746 = vmatpush1.msra.mxu1 %v2038_v45 }
 0x39a   :  { %747 = vmatprep.subr.mxu1 %v2043_v46 }
 0x39b   :  { %748 = vmatpush1.msra.mxu1 %v2048_v47 }
 0x39c   :  { %1007 = vmatprep.subr.mxu1 %v1946_v26 }
 0x44c   :  { %v508_v17 = vpop.f32.mrf.mxu1 }
 0x44d   :  { %v509_v20 = vadd.f32 %v508_v17, %v286_v16 }
 0x44e   :  { %v510_v21 = vpop.f32.mrf.mxu1 }
 0x44f   :  { %1721 = vtanh.f32 %v509_v20  ;;  %v511_v22 = vadd.f32 %v2131_v18, %v510_v21  ;;  %v1632_v25 = vmul.f32 -1.442695, %v509_v20 }
 0x451   :  { %1723 = vtanh.f32 %v511_v22  ;;  %v1633_v27 = vmul.f32 -1.442695, %v511_v22 }
 0x452   :  { %1725 = vpow2.f32 %v1632_v25 }
 0x453   :  { %1727 = vpow2.f32 %v1633_v27 }
 0x45c   :  { %v1722_v23 = vpop.eup %1721 }
 0x45d   :  { %529 = vrot.lane.b32.xlu0 %v1722_v23, %s1843_s14 }
 0x45e   :  { %v1724_v24 = vpop.eup %1723 }
 0x45f   :  { %546 = vrot.lane.b32.xlu1 %v1724_v24, %s1843_s14  ;;  %v1726_v28 = vpop.eup %1725 }
 0x460   :  { %v1728_v32 = vpop.eup %1727  ;;  %v519_v35 = vadd.f32 1.0, %v1726_v28 }
 0x461   :  { %v520_v38 = vadd.f32 1.0, %v1728_v32 }
 0x462   :  { %1729 = vrcp.f32 %v519_v35 }
 0x463   :  { %1731 = vrcp.f32 %v520_v38 }
 0x46f   :  { %v1730_v41 = vpop.eup %1729 }
 0x470   :  { %v1732_v51 = vpop.eup %1731  ;;  %v527_v54 = vmul.f32 %v1730_v41, %v427_v10 }
 0x471   :  { %v544_v57 = vmul.f32 0.0, %v1732_v51 }
 0x4cf   :  { %v530_v49 = vpop.permute.xlu0 %529 }
 0x4d0   :  { %v532_v50 = vmul.f32 %v1730_v41, %v530_v49 }
 0x4d1   :  { %v547_v52 = vpop.permute.xlu1 %546 }
 0x4d2   :  { %534 = vrot.lane.b32.xlu0 %v532_v50, %s1844_s4  ;;  %v549_v53 = vmul.f32 %v1732_v51, %v547_v52 }
 0x4d4   :  { %551 = vrot.lane.b32.xlu1 %v549_v53, %s1844_s4 }
 0x544   :  { %v535_v55 = vpop.permute.xlu0 %534 }
 0x545   :  { %v2138_v56 = vadd.f32 %v535_v55, %v527_v54 }
 0x546   :  { %v552_v58 = vpop.permute.xlu1 %551 }
 0x547   :  { %1733 = vtanh.f32 %v2138_v56  ;;  %v2141_v59 = vadd.f32 %v552_v58, %v544_v57 }
 0x549   :  { %1735 = vtanh.f32 %v2141_v59 }
 0x554   :  { %v1734_v61 = vpop.eup %1733 }
 0x555   :  { %540 = vrot.lane.b32.xlu0 %v1734_v61, %s1843_s14  ;;  %v287_v61 = vcombine.high %v2173_v8, %v2173_v8 }
 0x556   :  { %v1736_v63 = vpop.eup %1735 }
 0x557   :  { %557 = vrot.lane.b32.xlu1 %v1736_v63, %s1843_s14 }
 0x5c7   :  { %v541_v0 = vpop.permute.xlu0 %540 }
 0x5c8   :  { %v543_v1 = vmul.f32 %v1730_v41, %v541_v0 }
 0x5c9   :  { %v558_v2 = vpop.permute.xlu1 %557 }
 0x5ca   :  { %569 = vrot.lane.b32.xlu0 %v543_v1, %s1844_s4  ;;  %v2147_v3 = vmul.f32 %v1732_v51, %v558_v2 }
 0x5cc   :  { %573 = vrot.lane.b32.xlu1 %v2147_v3, %s1843_s14 }
 0x63c   :  { %v570_v4 = vpop.permute.xlu0 %569 }
 0x63e   :  { %v574_v5 = vpop.permute.xlu1 %573 }
 0x63f   :  { %v576_v6 = vsel %vm95_vm0, %v570_v4, %v574_v5 }
 0x640   :  { %1634 = vmatmul.mubr.msk.f32.vlgmr.msra.gmra.mxu0 %vm336_vm1, %v576_v6 }
 0x641   :  { %871 = vmatpush1.msra.mxu0 %v1952_v29  ;;  %918 = vmatprep.mubr.f32.mxu0 %v1842_v48 }
 0x642   :  { %872 = vmatprep.subr.mxu0 %v1958_v30 }
 0x643   :  { %873 = vmatpush1.msra.mxu0 %v1964_v31 }
 0x644   :  { %874 = vmatprep.subr.mxu0 %v1975_v33 }
 0x645   :  { %875 = vmatpush1.msra.mxu0 %v1981_v34 }
 0x646   :  { %876 = vmatprep.subr.mxu0 %v1990_v36 }
 0x647   :  { %877 = vmatpush1.msra.mxu0 %v1996_v37 }
 0x648   :  { %878 = vmatprep.subr.mxu0 %v2005_v39 }
 0x649   :  { %879 = vmatpush1.msra.mxu0 %v2011_v40 }
 0x64a   :  { %880 = vmatprep.subr.mxu0 %v2020_v42 }
 0x64b   :  { %881 = vmatpush1.msra.mxu0 %v2026_v43 }
 0x64c   :  { %882 = vmatprep.subr.mxu0 %v2032_v44 }
 0x64d   :  { %883 = vmatpush1.msra.mxu0 %v2038_v45 }
 0x64e   :  { %884 = vmatprep.subr.mxu0 %v2043_v46 }
 0x64f   :  { %885 = vmatpush1.msra.mxu0 %v2048_v47 }
 0x650   :  { %1144 = vmatprep.subr.mxu0 %v1946_v26 }
 0x700   :  { %v646_v9 = vpop.f32.mrf.mxu0 }
 0x701   :  { %v647_v10 = vadd.f32 %v646_v9, %v2173_v8 }
 0x702   :  { %v648_v11 = vpop.f32.mrf.mxu0 }
 0x703   :  { %1737 = vtanh.f32 %v647_v10  ;;  %v649_v12 = vadd.f32 %v2131_v18, %v648_v11  ;;  %v1635_v15 = vmul.f32 -1.442695, %v647_v10 }
 0x705   :  { %1739 = vtanh.f32 %v649_v12  ;;  %v1636_v16 = vmul.f32 -1.442695, %v649_v12 }
 0x706   :  { %1741 = vpow2.f32 %v1635_v15 }
 0x707   :  { %1743 = vpow2.f32 %v1636_v16 }
 0x710   :  { %v1738_v13 = vpop.eup %1737 }
 0x711   :  { %667 = vrot.lane.b32.xlu0 %v1738_v13, %s1843_s14 }
 0x712   :  { %v1740_v14 = vpop.eup %1739 }
 0x713   :  { %684 = vrot.lane.b32.xlu1 %v1740_v14, %s1843_s14  ;;  %v1742_v62 = vpop.eup %1741 }
 0x714   :  { %v1744_v17 = vpop.eup %1743  ;;  %v657_v20 = vadd.f32 1.0, %v1742_v62 }
 0x715   :  { %v658_v21 = vadd.f32 1.0, %v1744_v17 }
 0x716   :  { %1745 = vrcp.f32 %v657_v20 }
 0x717   :  { %1747 = vrcp.f32 %v658_v21 }
 0x723   :  { %v1746_v22 = vpop.eup %1745 }
 0x724   :  { %v1748_v25 = vpop.eup %1747  ;;  %v665_v32 = vmul.f32 %v1746_v22, %v2138_v56 }
 0x725   :  { %v682_v41 = vmul.f32 %v1748_v25, %v2141_v59 }
 0x783   :  { %v668_v23 = vpop.permute.xlu0 %667 }
 0x784   :  { %v670_v24 = vmul.f32 %v1746_v22, %v668_v23 }
 0x785   :  { %v685_v27 = vpop.permute.xlu1 %684 }
 0x786   :  { %672 = vrot.lane.b32.xlu0 %v670_v24, %s1844_s4  ;;  %v687_v28 = vmul.f32 %v1748_v25, %v685_v27 }
 0x788   :  { %689 = vrot.lane.b32.xlu1 %v687_v28, %s1844_s4 }
 0x7f8   :  { %v673_v35 = vpop.permute.xlu0 %672 }
 0x7f9   :  { %v2182_v38 = vadd.f32 %v673_v35, %v665_v32 }
 0x7fa   :  { %v690_v49 = vpop.permute.xlu1 %689 }
 0x7fb   :  { %1749 = vtanh.f32 %v2182_v38  ;;  %v2186_v50 = vadd.f32 %v690_v49, %v682_v41 }
 0x7fd   :  { %1751 = vtanh.f32 %v2186_v50 }
 0x808   :  { %v1750_v51 = vpop.eup %1749 }
 0x809   :  { %678 = vrot.lane.b32.xlu0 %v1750_v51, %s1843_s14  ;;  %v2258_v51 = vrot.slane %v2099_v60, %v1937_v19 }
 0x80a   :  { %v1752_v52 = vpop.eup %1751 }
 0x80b   :  { %695 = vrot.lane.b32.xlu1 %v1752_v52, %s1843_s14 }
 0x87b   :  { %v679_v53 = vpop.permute.xlu0 %678 }
 0x87c   :  { %v681_v54 = vmul.f32 %v1746_v22, %v679_v53 }
 0x87d   :  { %v696_v55 = vpop.permute.xlu1 %695 }
 0x87e   :  { %706 = vrot.lane.b32.xlu0 %v681_v54, %s1844_s4  ;;  %v2192_v56 = vmul.f32 %v1748_v25, %v696_v55 }
 0x880   :  { %710 = vrot.lane.b32.xlu1 %v2192_v56, %s1843_s14 }
 0x8f0   :  { %v707_v57 = vpop.permute.xlu0 %706 }
 0x8f2   :  { %v711_v58 = vpop.permute.xlu1 %710 }
 0x8f3   :  { %v713_v59 = vsel %vm95_vm0, %v707_v57, %v711_v58 }
 0x8f4   :  { %1637 = vmatmul.mubr.msk.f32.vlgmr.msra.gmra.mxu1 %vm336_vm1, %v713_v59 }
 0x8f5   :  { %1008 = vmatpush1.msra.mxu1 %v1952_v29  ;;  %1055 = vmatprep.mubr.f32.mxu1 %v1842_v48 }
 0x8f6   :  { %1009 = vmatprep.subr.mxu1 %v1958_v30 }
 0x8f7   :  { %1010 = vmatpush1.msra.mxu1 %v1964_v31 }
 0x8f8   :  { %1011 = vmatprep.subr.mxu1 %v1975_v33 }
 0x8f9   :  { %1012 = vmatpush1.msra.mxu1 %v1981_v34 }
 0x8fa   :  { %1013 = vmatprep.subr.mxu1 %v1990_v36 }
 0x8fb   :  { %1014 = vmatpush1.msra.mxu1 %v1996_v37 }
 0x8fc   :  { %1015 = vmatprep.subr.mxu1 %v2005_v39 }
 0x8fd   :  { %1016 = vmatpush1.msra.mxu1 %v2011_v40 }
 0x8fe   :  { %1017 = vmatprep.subr.mxu1 %v2020_v42 }
 0x8ff   :  { %1018 = vmatpush1.msra.mxu1 %v2026_v43 }
 0x900   :  { %1019 = vmatprep.subr.mxu1 %v2032_v44 }
 0x901   :  { %1020 = vmatpush1.msra.mxu1 %v2038_v45 }
 0x902   :  { %1021 = vmatprep.subr.mxu1 %v2043_v46 }
 0x903   :  { %1022 = vmatpush1.msra.mxu1 %v2048_v47 }
 0x904   :  { %1281 = vmatprep.subr.mxu1 %v1946_v26 }
 0x9b4   :  { %v783_v63 = vpop.f32.mrf.mxu1 }
 0x9b5   :  { %v784_v0 = vadd.f32 %v783_v63, %v287_v61 }
 0x9b6   :  { %v785_v1 = vpop.f32.mrf.mxu1 }
 0x9b7   :  { %1753 = vtanh.f32 %v784_v0  ;;  %v786_v2 = vadd.f32 %v2131_v18, %v785_v1  ;;  %v1638_v6 = vmul.f32 -1.442695, %v784_v0 }
 0x9b9   :  { %1755 = vtanh.f32 %v786_v2  ;;  %v1639_v7 = vmul.f32 -1.442695, %v786_v2 }
 0x9ba   :  { %1757 = vpow2.f32 %v1638_v6 }
 0x9bb   :  { %1759 = vpow2.f32 %v1639_v7 }
 0x9c4   :  { %v1754_v4 = vpop.eup %1753 }
 0x9c5   :  { %804 = vrot.lane.b32.xlu0 %v1754_v4, %s1843_s14 }
 0x9c6   :  { %v1756_v5 = vpop.eup %1755 }
 0x9c7   :  { %821 = vrot.lane.b32.xlu1 %v1756_v5, %s1843_s14  ;;  %v1758_v9 = vpop.eup %1757 }
 0x9c8   :  { %v1760_v10 = vpop.eup %1759  ;;  %v794_v8 = vadd.f32 1.0, %v1758_v9 }
 0x9c9   :  { %v795_v11 = vadd.f32 1.0, %v1760_v10 }
 0x9ca   :  { %1761 = vrcp.f32 %v794_v8 }
 0x9cb   :  { %1763 = vrcp.f32 %v795_v11 }
 0x9d7   :  { %v1762_v12 = vpop.eup %1761 }
 0x9d8   :  { %v1764_v15 = vpop.eup %1763  ;;  %v802_v17 = vmul.f32 %v1762_v12, %v2182_v38 }
 0x9d9   :  { %v819_v22 = vmul.f32 %v1764_v15, %v2186_v50 }
 0xa37   :  { %v805_v13 = vpop.permute.xlu0 %804 }
 0xa38   :  { %v807_v14 = vmul.f32 %v1762_v12, %v805_v13 }
 0xa39   :  { %v822_v16 = vpop.permute.xlu1 %821 }
 0xa3a   :  { %809 = vrot.lane.b32.xlu0 %v807_v14, %s1844_s4  ;;  %v824_v62 = vmul.f32 %v1764_v15, %v822_v16 }
 0xa3c   :  { %826 = vrot.lane.b32.xlu1 %v824_v62, %s1844_s4 }
 0xaac   :  { %v810_v20 = vpop.permute.xlu0 %809 }
 0xaad   :  { %v2223_v21 = vadd.f32 %v810_v20, %v802_v17 }
 0xaae   :  { %v827_v23 = vpop.permute.xlu1 %826 }
 0xaaf   :  { %1765 = vtanh.f32 %v2223_v21  ;;  %v2227_v24 = vadd.f32 %v827_v23, %v819_v22 }
 0xab1   :  { %1767 = vtanh.f32 %v2227_v24 }
 0xabc   :  { %v1766_v25 = vpop.eup %1765 }
 0xabd   :  { %815 = vrot.lane.b32.xlu0 %v1766_v25, %s1843_s14  ;;  %v303_v25 = vcombine.high %v2258_v51, %v2258_v51 }
 0xabe   :  { %v1768_v27 = vpop.eup %1767 }
 0xabf   :  { %832 = vrot.lane.b32.xlu1 %v1768_v27, %s1843_s14 }
 0xb2f   :  { %v816_v28 = vpop.permute.xlu0 %815 }
 0xb30   :  { %v818_v32 = vmul.f32 %v1762_v12, %v816_v28 }
 0xb31   :  { %v833_v35 = vpop.permute.xlu1 %832 }
 0xb32   :  { %843 = vrot.lane.b32.xlu0 %v818_v32, %s1844_s4  ;;  %v2233_v38 = vmul.f32 %v1764_v15, %v833_v35 }
 0xb34   :  { %847 = vrot.lane.b32.xlu1 %v2233_v38, %s1843_s14 }
 0xba4   :  { %v844_v41 = vpop.permute.xlu0 %843 }
 0xba6   :  { %v848_v49 = vpop.permute.xlu1 %847 }
 0xba7   :  { %v850_v50 = vsel %vm95_vm0, %v844_v41, %v848_v49 }
 0xba8   :  { %1640 = vmatmul.mubr.msk.f32.vlgmr.msra.gmra.mxu0 %vm336_vm1, %v850_v50 }
 0xba9   :  { %1145 = vmatpush1.msra.mxu0 %v1952_v29  ;;  %1192 = vmatprep.mubr.f32.mxu0 %v1842_v48 }
 0xbaa   :  { %1146 = vmatprep.subr.mxu0 %v1958_v30 }
 0xbab   :  { %1147 = vmatpush1.msra.mxu0 %v1964_v31 }
 0xbac   :  { %1148 = vmatprep.subr.mxu0 %v1975_v33 }
 0xbad   :  { %1149 = vmatpush1.msra.mxu0 %v1981_v34 }
 0xbae   :  { %1150 = vmatprep.subr.mxu0 %v1990_v36 }
 0xbaf   :  { %1151 = vmatpush1.msra.mxu0 %v1996_v37 }
 0xbb0   :  { %1152 = vmatprep.subr.mxu0 %v2005_v39 }
 0xbb1   :  { %1153 = vmatpush1.msra.mxu0 %v2011_v40 }
 0xbb2   :  { %1154 = vmatprep.subr.mxu0 %v2020_v42 }
 0xbb3   :  { %1155 = vmatpush1.msra.mxu0 %v2026_v43 }
 0xbb4   :  { %1156 = vmatprep.subr.mxu0 %v2032_v44 }
 0xbb5   :  { %1157 = vmatpush1.msra.mxu0 %v2038_v45 }
 0xbb6   :  { %1158 = vmatprep.subr.mxu0 %v2043_v46 }
 0xbb7   :  { %1159 = vmatpush1.msra.mxu0 %v2048_v47 }
 0xbb8   :  { %1418 = vmatprep.subr.mxu0 %v1946_v26 }
 0xc68   :  { %v920_v52 = vpop.f32.mrf.mxu0 }
 0xc69   :  { %v921_v53 = vadd.f32 %v920_v52, %v2258_v51 }
 0xc6a   :  { %v922_v54 = vpop.f32.mrf.mxu0 }
 0xc6b   :  { %1769 = vtanh.f32 %v921_v53  ;;  %v923_v55 = vadd.f32 %v2131_v18, %v922_v54  ;;  %v1641_v59 = vmul.f32 -1.442695, %v921_v53 }
 0xc6d   :  { %1771 = vtanh.f32 %v923_v55  ;;  %v1642_v26 = vmul.f32 -1.442695, %v923_v55 }
 0xc6e   :  { %1773 = vpow2.f32 %v1641_v59 }
 0xc6f   :  { %1775 = vpow2.f32 %v1642_v26 }
 0xc78   :  { %v1770_v57 = vpop.eup %1769 }
 0xc79   :  { %941 = vrot.lane.b32.xlu0 %v1770_v57, %s1843_s14 }
 0xc7a   :  { %v1772_v58 = vpop.eup %1771 }
 0xc7b   :  { %958 = vrot.lane.b32.xlu1 %v1772_v58, %s1843_s14  ;;  %v1774_v61 = vpop.eup %1773 }
 0xc7c   :  { %v1776_v63 = vpop.eup %1775  ;;  %v931_v0 = vadd.f32 1.0, %v1774_v61 }
 0xc7d   :  { %v932_v1 = vadd.f32 1.0, %v1776_v63 }
 0xc7e   :  { %1777 = vrcp.f32 %v931_v0 }
 0xc7f   :  { %1779 = vrcp.f32 %v932_v1 }
 0xc8b   :  { %v1778_v2 = vpop.eup %1777 }
 0xc8c   :  { %v1780_v6 = vpop.eup %1779  ;;  %v939_v10 = vmul.f32 %v1778_v2, %v2223_v21 }
 0xc8d   :  { %v956_v12 = vmul.f32 %v1780_v6, %v2227_v24 }
 0xceb   :  { %v942_v4 = vpop.permute.xlu0 %941 }
 0xcec   :  { %v944_v5 = vmul.f32 %v1778_v2, %v942_v4 }
 0xced   :  { %v959_v7 = vpop.permute.xlu1 %958 }
 0xcee   :  { %946 = vrot.lane.b32.xlu0 %v944_v5, %s1844_s4  ;;  %v961_v9 = vmul.f32 %v1780_v6, %v959_v7 }
 0xcf0   :  { %963 = vrot.lane.b32.xlu1 %v961_v9, %s1844_s4 }
 0xd60   :  { %v947_v8 = vpop.permute.xlu0 %946 }
 0xd61   :  { %v2267_v11 = vadd.f32 %v947_v8, %v939_v10 }
 0xd62   :  { %v964_v13 = vpop.permute.xlu1 %963 }
 0xd63   :  { %1781 = vtanh.f32 %v2267_v11  ;;  %v2271_v14 = vadd.f32 %v964_v13, %v956_v12 }
 0xd65   :  { %1783 = vtanh.f32 %v2271_v14 }
 0xd70   :  { %v1782_v15 = vpop.eup %1781 }
 0xd71   :  { %952 = vrot.lane.b32.xlu0 %v1782_v15, %s1843_s14 }
 0xd72   :  { %v1784_v16 = vpop.eup %1783 }
 0xd73   :  { %969 = vrot.lane.b32.xlu1 %v1784_v16, %s1843_s14 }
 0xde3   :  { %v953_v62 = vpop.permute.xlu0 %952 }
 0xde4   :  { %v955_v17 = vmul.f32 %v1778_v2, %v953_v62 }
 0xde5   :  { %v970_v20 = vpop.permute.xlu1 %969 }
 0xde6   :  { %980 = vrot.lane.b32.xlu0 %v955_v17, %s1844_s4  ;;  %v2277_v21 = vmul.f32 %v1780_v6, %v970_v20 }
 0xde8   :  { %984 = vrot.lane.b32.xlu1 %v2277_v21, %s1843_s14 }
 0xe58   :  { %v981_v22 = vpop.permute.xlu0 %980 }
 0xe5a   :  { %v985_v23 = vpop.permute.xlu1 %984 }
 0xe5b   :  { %v987_v24 = vsel %vm95_vm0, %v981_v22, %v985_v23 }
 0xe5c   :  { %1643 = vmatmul.mubr.msk.f32.vlgmr.msra.gmra.mxu1 %vm336_vm1, %v987_v24 }
 0xe5d   :  { %1282 = vmatpush1.msra.mxu1 %v1952_v29  ;;  %1329 = vmatprep.mubr.f32.mxu1 %v1842_v48 }
 0xe5e   :  { %1283 = vmatprep.subr.mxu1 %v1958_v30 }
 0xe5f   :  { %1284 = vmatpush1.msra.mxu1 %v1964_v31 }
 0xe60   :  { %1285 = vmatprep.subr.mxu1 %v1975_v33 }
 0xe61   :  { %1286 = vmatpush1.msra.mxu1 %v1981_v34 }
 0xe62   :  { %1287 = vmatprep.subr.mxu1 %v1990_v36 }
 0xe63   :  { %1288 = vmatpush1.msra.mxu1 %v1996_v37 }
 0xe64   :  { %1289 = vmatprep.subr.mxu1 %v2005_v39 }
 0xe65   :  { %1290 = vmatpush1.msra.mxu1 %v2011_v40 }
 0xe66   :  { %1291 = vmatprep.subr.mxu1 %v2020_v42 }
 0xe67   :  { %1292 = vmatpush1.msra.mxu1 %v2026_v43 }
 0xe68   :  { %1293 = vmatprep.subr.mxu1 %v2032_v44 }
 0xe69   :  { %1294 = vmatpush1.msra.mxu1 %v2038_v45 }
 0xe6a   :  { %1295 = vmatprep.subr.mxu1 %v2043_v46 }
 0xe6b   :  { %1296 = vmatpush1.msra.mxu1 %v2048_v47 }
 0xf1c   :  { %v1057_v27 = vpop.f32.mrf.mxu1 }
 0xf1d   :  { %v1058_v28 = vadd.f32 %v1057_v27, %v303_v25 }
 0xf1e   :  { %v1059_v32 = vpop.f32.mrf.mxu1 }
 0xf1f   :  { %1785 = vtanh.f32 %v1058_v28  ;;  %v1060_v35 = vadd.f32 %v2131_v18, %v1059_v32  ;;  %v1644_v50 = vmul.f32 -1.442695, %v1058_v28 }
 0xf21   :  { %1787 = vtanh.f32 %v1060_v35  ;;  %v1645_v52 = vmul.f32 -1.442695, %v1060_v35 }
 0xf22   :  { %1789 = vpow2.f32 %v1644_v50 }
 0xf23   :  { %1791 = vpow2.f32 %v1645_v52 }
 0xf2c   :  { %v1786_v41 = vpop.eup %1785 }
 0xf2d   :  { %1078 = vrot.lane.b32.xlu0 %v1786_v41, %s1843_s14 }
 0xf2e   :  { %v1788_v49 = vpop.eup %1787 }
 0xf2f   :  { %1095 = vrot.lane.b32.xlu1 %v1788_v49, %s1843_s14  ;;  %v1790_v53 = vpop.eup %1789 }
 0xf30   :  { %v1792_v54 = vpop.eup %1791  ;;  %v1068_v51 = vadd.f32 1.0, %v1790_v53 }
 0xf31   :  { %v1069_v55 = vadd.f32 1.0, %v1792_v54 }
 0xf32   :  { %1793 = vrcp.f32 %v1068_v51 }
 0xf33   :  { %1795 = vrcp.f32 %v1069_v55 }
 0xf3f   :  { %v1794_v57 = vpop.eup %1793 }
 0xf40   :  { %v1796_v26 = vpop.eup %1795  ;;  %v1076_v0 = vmul.f32 %v1794_v57, %v2267_v11 }
 0xf41   :  { %v1093_v4 = vmul.f32 %v1796_v26, %v2271_v14 }
 0xf9f   :  { %v1079_v58 = vpop.permute.xlu0 %1078 }
 0xfa0   :  { %v1081_v59 = vmul.f32 %v1794_v57, %v1079_v58 }
 0xfa1   :  { %v1096_v61 = vpop.permute.xlu1 %1095 }
 0xfa2   :  { %1083 = vrot.lane.b32.xlu0 %v1081_v59, %s1844_s4  ;;  %v1098_v63 = vmul.f32 %v1796_v26, %v1096_v61 }
 0xfa4   :  { %1100 = vrot.lane.b32.xlu1 %v1098_v63, %s1844_s4 }
0x1014   :  { %v1084_v1 = vpop.permute.xlu0 %1083 }
0x1015   :  { %v2307_v2 = vadd.f32 %v1084_v1, %v1076_v0 }
0x1016   :  { %v1101_v5 = vpop.permute.xlu1 %1100 }
0x1017   :  { %1797 = vtanh.f32 %v2307_v2  ;;  %v2311_v6 = vadd.f32 %v1101_v5, %v1093_v4 }
0x1019   :  { %1799 = vtanh.f32 %v2311_v6 }
0x1024   :  { %v1798_v7 = vpop.eup %1797 }
0x1025   :  { %1089 = vrot.lane.b32.xlu0 %v1798_v7, %s1843_s14 }
0x1026   :  { %v1800_v9 = vpop.eup %1799 }
0x1027   :  { %1106 = vrot.lane.b32.xlu1 %v1800_v9, %s1843_s14 }
0x1097   :  { %v1090_v10 = vpop.permute.xlu0 %1089 }
0x1098   :  { %v1092_v8 = vmul.f32 %v1794_v57, %v1090_v10 }
0x1099   :  { %v1107_v11 = vpop.permute.xlu1 %1106 }
0x109a   :  { %1117 = vrot.lane.b32.xlu0 %v1092_v8, %s1844_s4  ;;  %v2317_v12 = vmul.f32 %v1796_v26, %v1107_v11 }
0x109c   :  { %1121 = vrot.lane.b32.xlu1 %v2317_v12, %s1843_s14 }
0x110c   :  { %v1118_v13 = vpop.permute.xlu0 %1117 }
0x110e   :  { %v1122_v14 = vpop.permute.xlu1 %1121 }
0x110f   :  { %v1124_v15 = vsel %vm95_vm0, %v1118_v13, %v1122_v14 }
0x1110   :  { %1646 = vmatmul.mubr.msk.f32.vlgmr.msra.gmra.mxu0 %vm336_vm1, %v1124_v15 }
0x1111   :  { %1419 = vmatpush1.msra.mxu0 %v1952_v29  ;;  %1466 = vmatprep.mubr.f32.mxu0 %v1842_v48  ;;  %v288_v29 = vcombine.high %v2099_v60, %v2099_v60 }
0x1112   :  { %1420 = vmatprep.subr.mxu0 %v1958_v30 }
0x1113   :  { %1421 = vmatpush1.msra.mxu0 %v1964_v31  ;;  %v302_v30 = vrot.slane %v288_v29, %v1937_v19 }
0x1114   :  { %1422 = vmatprep.subr.mxu0 %v1975_v33 }
0x1115   :  { %1423 = vmatpush1.msra.mxu0 %v1981_v34  ;;  %v304_v54 = vcombine.high %v302_v30, %v302_v30 }
0x1116   :  { %1424 = vmatprep.subr.mxu0 %v1990_v36 }
0x1117   :  { %1425 = vmatpush1.msra.mxu0 %v1996_v37 }
0x1118   :  { %1426 = vmatprep.subr.mxu0 %v2005_v39 }
0x1119   :  { %1427 = vmatpush1.msra.mxu0 %v2011_v40 }
0x111a   :  { %1428 = vmatprep.subr.mxu0 %v2020_v42 }
0x111b   :  { %1429 = vmatpush1.msra.mxu0 %v2026_v43 }
0x111c   :  { %1430 = vmatprep.subr.mxu0 %v2032_v44 }
0x111d   :  { %1431 = vmatpush1.msra.mxu0 %v2038_v45 }
0x111e   :  { %1432 = vmatprep.subr.mxu0 %v2043_v46 }
0x111f   :  { %1433 = vmatpush1.msra.mxu0 %v2048_v47 }
0x11d0   :  { %v1194_v31 = vpop.f32.mrf.mxu0 }
0x11d1   :  { %v1195_v33 = vadd.f32 %v1194_v31, %v302_v30 }
0x11d2   :  { %v1196_v34 = vpop.f32.mrf.mxu0 }
0x11d3   :  { %1801 = vtanh.f32 %v1195_v33  ;;  %v1197_v36 = vadd.f32 %v2131_v18, %v1196_v34  ;;  %v1647_v40 = vmul.f32 -1.442695, %v1195_v33 }
0x11d5   :  { %1803 = vtanh.f32 %v1197_v36  ;;  %v1648_v42 = vmul.f32 -1.442695, %v1197_v36 }
0x11d6   :  { %1805 = vpow2.f32 %v1647_v40 }
0x11d7   :  { %1807 = vpow2.f32 %v1648_v42 }
0x11e0   :  { %v1802_v37 = vpop.eup %1801 }
0x11e1   :  { %1215 = vrot.lane.b32.xlu0 %v1802_v37, %s1843_s14 }
0x11e2   :  { %v1804_v39 = vpop.eup %1803 }
0x11e3   :  { %1232 = vrot.lane.b32.xlu1 %v1804_v39, %s1843_s14  ;;  %v1806_v43 = vpop.eup %1805 }
0x11e4   :  { %v1808_v44 = vpop.eup %1807  ;;  %v1205_v19 = vadd.f32 1.0, %v1806_v43 }
0x11e5   :  { %v1206_v45 = vadd.f32 1.0, %v1808_v44 }
0x11e6   :  { %1809 = vrcp.f32 %v1205_v19 }
0x11e7   :  { %1811 = vrcp.f32 %v1206_v45 }
0x11f3   :  { %v1810_v46 = vpop.eup %1809 }
0x11f4   :  { %v1812_v60 = vpop.eup %1811  ;;  %v1213_v17 = vmul.f32 %v1810_v46, %v2307_v2 }
0x11f5   :  { %v1230_v23 = vmul.f32 %v1812_v60, %v2311_v6 }
0x1253   :  { %v1216_v47 = vpop.permute.xlu0 %1215 }
0x1254   :  { %v1218_v48 = vmul.f32 %v1810_v46, %v1216_v47 }
0x1255   :  { %v1233_v16 = vpop.permute.xlu1 %1232 }
0x1256   :  { %1220 = vrot.lane.b32.xlu0 %v1218_v48, %s1844_s4  ;;  %v1235_v62 = vmul.f32 %v1812_v60, %v1233_v16 }
0x1258   :  { %1237 = vrot.lane.b32.xlu1 %v1235_v62, %s1844_s4 }
0x12c8   :  { %v1221_v20 = vpop.permute.xlu0 %1220 }
0x12c9   :  { %v1223_v22 = vadd.f32 %v1221_v20, %v1213_v17  ;;  %v561_v20 = vmax.f32 %v2147_v3, 0.0 }
0x12ca   :  { %v1238_v24 = vpop.permute.xlu1 %1237 }
0x12cb   :  { %1813 = vtanh.f32 %v1223_v22  ;;  %v1240_v25 = vadd.f32 %v1238_v24, %v1230_v23 }
0x12cd   :  { %1815 = vtanh.f32 %v1240_v25 }
0x12d8   :  { %v1814_v27 = vpop.eup %1813 }
0x12d9   :  { %1226 = vrot.lane.b32.xlu0 %v1814_v27, %s1843_s14 }
0x12da   :  { %v1816_v28 = vpop.eup %1815 }
0x12db   :  { %1243 = vrot.lane.b32.xlu1 %v1816_v28, %s1843_s14 }
0x134b   :  { %v1227_v32 = vpop.permute.xlu0 %1226 }
0x134c   :  { %v1229_v35 = vmul.f32 %v1810_v46, %v1227_v32 }
0x134d   :  { %v1244_v41 = vpop.permute.xlu1 %1243 }
0x134e   :  { %1254 = vrot.lane.b32.xlu0 %v1229_v35, %s1844_s4  ;;  %v2352_v49 = vmul.f32 %v1812_v60, %v1244_v41  ;;  %v699_v35 = vmax.f32 %v2192_v56, 0.0  ;;  %v1507_v56 = vld [vmem:[%s2443_s7 + $0x18] sm:$0xff] }
0x134f   :  { %1697 = vmatprep.subr.mxu1 %v1507_v56 }
0x1350   :  { %1258 = vrot.lane.b32.xlu1 %v2352_v49, %s1843_s14 }
0x13c0   :  { %v1255_v50 = vpop.permute.xlu0 %1254 }
0x13c2   :  { %v1259_v52 = vpop.permute.xlu1 %1258 }
0x13c3   :  { %v1261_v53 = vsel %vm95_vm0, %v1255_v50, %v1259_v52  ;;  %v973_v50 = vmax.f32 %v2277_v21, 0.0  ;;  %v1247_v52 = vmax.f32 %v2352_v49, 0.0  ;;  %v1506_v21 = vld [vmem:[%s2443_s7 + $0x10] sm:$0xff]  ;;  %v1505_v49 = vld [vmem:[%s2443_s7 + $0x8] sm:$0xff] }
0x13c4   :  { %1649 = vmatmul.mubr.msk.f32.vlgmr.msra.gmra.mxu1 %vm336_vm1, %v1261_v53 }
0x13c5   :  { %1698 = vmatpush3.msra.mxu1 %v1507_v56 }
0x13c6   :  { %1699 = vmatprep.subr.mxu1 %v1506_v21 }
0x13c7   :  { %1700 = vmatpush3.msra.mxu1 %v1506_v21 }
0x13c8   :  { %1701 = vmatprep.subr.mxu1 %v1505_v49 }
0x13c9   :  { %1702 = vmatpush3.msra.mxu1 %v1505_v49 }
0x1484   :  { %v1331_v51 = vpop.f32.mrf.mxu1 }
0x1485   :  { %v1332_v55 = vadd.f32 %v1331_v51, %v304_v54  ;;  %v1504_v54 = vld [vmem:[%s2443_s7] sm:$0xff] }
0x1486   :  { %v1333_v57 = vpop.f32.mrf.mxu1  ;;  %1703 = vmatprep.subr.mxu1 %v1504_v54 }
0x1487   :  { %1817 = vtanh.f32 %v1332_v55  ;;  %v1334_v58 = vadd.f32 %v2131_v18, %v1333_v57  ;;  %v1650_v61 = vmul.f32 -1.442695, %v1332_v55  ;;  %1704 = vmatpush3.msra.mxu1 %v1504_v54 }
0x1489   :  { %1819 = vtanh.f32 %v1334_v58  ;;  %v1651_v63 = vmul.f32 -1.442695, %v1334_v58 }
0x148a   :  { %1821 = vpow2.f32 %v1650_v61 }
0x148b   :  { %1823 = vpow2.f32 %v1651_v63 }
0x1494   :  { %v1818_v59 = vpop.eup %1817 }
0x1495   :  { %1352 = vrot.lane.b32.xlu0 %v1818_v59, %s1843_s14 }
0x1496   :  { %v1820_v26 = vpop.eup %1819 }
0x1497   :  { %1369 = vrot.lane.b32.xlu1 %v1820_v26, %s1843_s14  ;;  %v1822_v0 = vpop.eup %1821 }
0x1498   :  { %v1824_v1 = vpop.eup %1823  ;;  %v1342_v2 = vadd.f32 1.0, %v1822_v0 }
0x1499   :  { %v1343_v4 = vadd.f32 1.0, %v1824_v1 }
0x149a   :  { %1825 = vrcp.f32 %v1342_v2  ;;  %v1654_v2 = vld [vmem:[%s2444_s8] ss:$0 sm:$0xff] }
0x149b   :  { %1827 = vrcp.f32 %v1343_v4 }
0x14a7   :  { %v1826_v5 = vpop.eup %1825 }
0x14a8   :  { %v1828_v9 = vpop.eup %1827  ;;  %v1350_v11 = vmul.f32 %v1826_v5, %v1223_v22  ;;  %v1110_v22 = vmax.f32 %v2317_v12, 0.0 }
0x14a9   :  { %v1367_v15 = vmul.f32 %v1828_v9, %v1240_v25 }
0x1507   :  { %v1353_v6 = vpop.permute.xlu0 %1352 }
0x1508   :  { %v1355_v7 = vmul.f32 %v1826_v5, %v1353_v6 }
0x1509   :  { %v1370_v10 = vpop.permute.xlu1 %1369 }
0x150a   :  { %1357 = vrot.lane.b32.xlu0 %v1355_v7, %s1844_s4  ;;  %v1372_v8 = vmul.f32 %v1828_v9, %v1370_v10 }
0x150c   :  { %1374 = vrot.lane.b32.xlu1 %v1372_v8, %s1844_s4 }
0x157c   :  { %v1358_v13 = vpop.permute.xlu0 %1357 }
0x157d   :  { %v1360_v14 = vadd.f32 %v1358_v13, %v1350_v11 }
0x157e   :  { %v1375_v29 = vpop.permute.xlu1 %1374 }
0x157f   :  { %1829 = vtanh.f32 %v1360_v14  ;;  %v1377_v30 = vadd.f32 %v1375_v29, %v1367_v15 }
0x1581   :  { %1831 = vtanh.f32 %v1377_v30 }
0x158c   :  { %v1830_v31 = vpop.eup %1829 }
0x158d   :  { %1363 = vrot.lane.b32.xlu0 %v1830_v31, %s1843_s14 }
0x158e   :  { %v1832_v33 = vpop.eup %1831 }
0x158f   :  { %1380 = vrot.lane.b32.xlu1 %v1832_v33, %s1843_s14 }
0x15ff   :  { %v1364_v34 = vpop.permute.xlu0 %1363 }
0x1600   :  { %v1366_v36 = vmul.f32 %v1826_v5, %v1364_v34 }
0x1601   :  { %v1381_v37 = vpop.permute.xlu1 %1380 }
0x1602   :  { %1391 = vrot.lane.b32.xlu0 %v1366_v36, %s1844_s4  ;;  %v1383_v39 = vmul.f32 %v1828_v9, %v1381_v37 }
0x1604   :  { %1395 = vrot.lane.b32.xlu1 %v1383_v39, %s1843_s14  ;;  %v1384_v23 = vmax.f32 %v1383_v39, 0.0 }
0x1674   :  { %v1392_v40 = vpop.permute.xlu0 %1391 }
0x1675   :  { %1599 = vst.msk [vmem:[%s2442_s10] sm:$0x3] %vm566_vm2, %v1392_v40 }
0x1676   :  { %v1396_v42 = vpop.permute.xlu1 %1395 }
0x1677   :  { %v1398_v43 = vsel %vm95_vm0, %v1392_v40, %v1396_v42 }
0x1678   :  { %1652 = vmatmul.mubr.msk.f32.vlgmr.msra.gmra.mxu0 %vm336_vm1, %v1398_v43 }
0x1738   :  { %v1468_v44 = vpop.f32.mrf.mxu0 }
0x173a   :  { %v1469_v19 = vpop.f32.mrf.mxu0 }
0x173b   :  { %v1470_v45 = vadd.f32 %v2131_v18, %v1469_v19  ;;  %v836_v18 = vmax.f32 %v2233_v38, 0.0 }
0x173d   :  { %1833 = vtanh.f32 %v1470_v45  ;;  %v1653_v47 = vmul.f32 -1.442695, %v1470_v45 }
0x173f   :  { %1835 = vpow2.f32 %v1653_v47 }
0x174a   :  { %v1834_v46 = vpop.eup %1833 }
0x174b   :  { %1481 = vrot.lane.b32.xlu0 %v1834_v46, %s1843_s14 }
0x174c   :  { %v1836_v48 = vpop.eup %1835 }
0x174d   :  { %v1475_v60 = vadd.f32 1.0, %v1836_v48 }
0x174f   :  { %1837 = vrcp.f32 %v1475_v60 }
0x175c   :  { %v1838_v16 = vpop.eup %1837 }
0x175d   :  { %v1479_v24 = vmul.f32 %v1838_v16, %v1377_v30 }
0x17bd   :  { %v1482_v62 = vpop.permute.xlu0 %1481 }
0x17be   :  { %v1484_v17 = vmul.f32 %v1838_v16, %v1482_v62 }
0x17c0   :  { %1486 = vrot.lane.b32.xlu1 %v1484_v17, %s1844_s4 }
0x17c4   :  { %563 = vrot.lane.b32.xlu1 %v561_v20, %s1844_s4 }
0x17c8   :  { %838 = vrot.lane.b32.xlu1 %v836_v18, %s1844_s4 }
0x17cc   :  { %1112 = vrot.lane.b32.xlu1 %v1110_v22, %s1844_s4 }
0x17d0   :  { %1386 = vrot.lane.b32.xlu1 %v1384_v23, %s1844_s4 }
0x17d4   :  { %1601 = vrot.lane.b32.xlu1 %v1360_v14, %s1845_s17 }
0x1832   :  { %v1487_v25 = vpop.permute.xlu1 %1486 }
0x1833   :  { %v1489_v27 = vadd.f32 %v1487_v25, %v1479_v24 }
0x1835   :  { %1839 = vtanh.f32 %v1489_v27  ;;  %1611 = vrot.lane.b32.xlu1 %v1489_v27, %s1845_s17 }
0x1836   :  { %v564_v3 = vpop.permute.xlu1 %563 }
0x1837   :  { %567 = vst.msk [vmem:[#allocation2] sm:$0x3] %vm566_vm2, %v564_v3 }
0x183a   :  { %v839_v38 = vpop.permute.xlu1 %838 }
0x183b   :  { %841 = vst.msk [vmem:[#allocation2 + $0x4] sm:$0x3] %vm566_vm2, %v839_v38 }
0x183e   :  { %v1113_v28 = vpop.permute.xlu1 %1112 }
0x183f   :  { %1115 = vst.msk [vmem:[#allocation2 + $0x8] sm:$0x3] %vm566_vm2, %v1113_v28 }
0x1842   :  { %v1840_v12 = vpop.eup %1839  ;;  %v1387_v32 = vpop.permute.xlu1 %1386 }
0x1843   :  { %1389 = vst.msk [vmem:[#allocation2 + $0xc] sm:$0x3] %vm566_vm2, %v1387_v32  ;;  %1492 = vrot.lane.b32.xlu0 %v1840_v12, %s1843_s14 }
0x1846   :  { %v1602_v41 = vpop.permute.xlu1 %1601 }
0x1847   :  { %1604 = vst.msk [vmem:[%s2442_s10 + $0x4] sm:$0x3] %vm566_vm2, %v1602_v41  ;;  %701 = vrot.lane.b32.xlu0 %v699_v35, %s1844_s4 }
0x184b   :  { %975 = vrot.lane.b32.xlu0 %v973_v50, %s1844_s4 }
0x184f   :  { %1249 = vrot.lane.b32.xlu0 %v1247_v52, %s1844_s4 }
0x18a7   :  { %v1612_v53 = vpop.permute.xlu1 %1611 }
0x18a8   :  { %1614 = vst.msk [vmem:[%s2442_s10 + $0x6] sm:$0x3] %vm566_vm2, %v1612_v53 }
0x18b5   :  { %v1493_v51 = vpop.permute.xlu0 %1492 }
0x18b6   :  { %v1495_v55 = vmul.f32 %v1838_v16, %v1493_v51 }
0x18b8   :  { %v1496_v57 = vmax.f32 %v1495_v55, 0.0 }
0x18b9   :  { %v702_v58 = vpop.permute.xlu0 %701 }
0x18ba   :  { %704 = vst.msk [vmem:[#allocation2 + $0x2] sm:$0x3] %vm566_vm2, %v702_v58  ;;  %1498 = vrot.lane.b32.xlu0 %v1496_v57, %s1844_s4 }
0x18bd   :  { %v976_v59 = vpop.permute.xlu0 %975 }
0x18be   :  { %978 = vst.msk [vmem:[#allocation2 + $0x6] sm:$0x3] %vm566_vm2, %v976_v59  ;;  %1606 = vrot.lane.b32.xlu0 %v1495_v55, %s1844_s4 }
0x18c1   :  { %v1250_v26 = vpop.permute.xlu0 %1249 }
0x18c2   :  { %1252 = vst.msk [vmem:[#allocation2 + $0xa] sm:$0x3] %vm566_vm2, %v1250_v26 }
0x18c5   :  { %v1502_v61 = vld [vmem:[#allocation2] sm:$0xff] }
0x18c6   :  { %1705 = vmatprep.mubr.msk.f32.mxu1 %vm95_vm0, %v1502_v61 }
0x192c   :  { %v1499_v63 = vpop.permute.xlu0 %1498 }
0x192d   :  { %1501 = vst.msk [vmem:[#allocation2 + $0xe] sm:$0x3] %vm566_vm2, %v1499_v63 }
0x1930   :  { %v1607_v0 = vpop.permute.xlu0 %1606 }
0x1931   :  { %1609 = vst.msk [vmem:[%s2442_s10 + $0x2] sm:$0x3] %vm566_vm2, %v1607_v0 }
0x1934   :  { %v1503_v1 = vld [vmem:[#allocation2 + $0x8] sm:$0xff] }
0x1935   :  { %1706 = vmatmul.mubr.msk.f32.vlgmr.msra.gmra.mxu1 %vm95_vm0, %v1503_v1 }
0x19f5   :  { %v1707_v4 = vpop.f32.mrf.mxu1 }
0x19f6   :  { %v1593_v5 = vadd.f32 %v1707_v4, %v1654_v2 }
0x19f7   :  { %v1587_v6 = vpop.f32.mrf.mxu1 }
0x19f8   :  { %1598 = vst.msk [vmem:[%s2445_s9 + $0x8] sm:$0xff] %vm1596_vm3, %v1593_v5  ;;  %v1588_v7 = vadd.f32 %v1654_v2, %v1587_v6 }
0x19fa   :  { %1597 = vst.msk [vmem:[%s2445_s9] sm:$0xff] %vm1596_vm3, %v1588_v7 }

</bundles_post_ra>
